<compile_context>
chip_gen: v7x
topology: tpu7x:2x2x1
jax: 0.10.0
libtpu: 0.0.40
codegen_flags: <defaults>
</compile_context>

<pallas_src>
import functools

import jax
import jax.numpy as jnp
from jax import lax
from jax.experimental import pallas as pl
from jax.experimental.pallas import tpu as pltpu

# ------------------------- configuration (small shapes) -------------------------
B = 8            # batch
F = 4            # sender_input feature dim (= receiver agent output dim)
V = 16           # vocab_size
E = 16           # sender embedding dim
H = 32           # sender hidden size
ER = 16          # receiver embedding dim
HR = 32          # receiver hidden size
MAX_LEN = 7
T = MAX_LEN + 1  # message length incl. the forced zero (eos) column

SENDER_ENTROPY_COEFF = 0.1
RECEIVER_ENTROPY_COEFF = 0.0   # receiver is deterministic -> its entropy/log-prob terms are 0
LENGTH_COST = 1e-2
BASELINE_LOSS = 0.0            # MeanBaseline.predict() before any update
BASELINE_LENGTH = 0.0          # MeanBaseline.predict() before any update

_VMEM = functools.partial(pl.BlockSpec, memory_space=pltpu.MemorySpace.VMEM)

# ---------------- packed-parameter layout: one (PACK_ROWS, 64) f32 buffer ---------------
# Every segment starts on an 8-aligned sublane and at lane 0, so the in-kernel static slices
# never straddle an (8,128) tile boundary and never need lane shifts.
PACK_LANES = 64
P_AW = 0           # sender agent Linear weight           (F,  H)
P_AB = 8           # sender agent Linear bias             (1,  H)
P_SOS = 16         # sos_embedding @ W_ih                 (1,  H)
P_BS = 24          # b_ih + b_hh                          (1,  H)
P_BOUT = 32        # hidden_to_output bias                (1,  V)
P_WCAT = 40        # [W_out | W_hh]                       (H,  V+H)
P_EFCAT = 72       # [emb @ W_ih | emb_r @ W_ih_r]        (V,  H+HR)
P_WHHR = 88        # receiver W_hh                        (HR, HR)
P_BR = 120         # receiver b_ih + b_hh                 (1,  HR)
P_AWR = 128        # receiver agent Linear weight         (HR, F)
P_ABR = 160        # receiver agent Linear bias           (1,  F)
PACK_ROWS = 168

# ---------------- packed-output layout: one lane-dense (B, 128) f32 slab ----------------
OUT_LANES = 128
COL_OPT = 0                    # optimized loss (scalar, row 0)
COL_LOSS = 1                   # per-sample loss
COL_LEN = 2                    # message length (float)
COL_RO = 3                     # receiver output            (F lanes)
COL_ENT = COL_RO + F           # sender entropy per step    (T lanes)
COL_MSG = COL_ENT + T          # message symbols as floats  (T lanes)
_USED_LANES = COL_MSG + T      # = 23


# ------------------------------ fused game kernel --------------------------------
def _game_kernel(x_ref, p_ref, out_ref):
    x = x_ref[...]                                              # (B, F)

    # static, lane-0-based slices of the single packed parameter buffer
    aw = p_ref[P_AW:P_AW + F, :H]
    ab = p_ref[P_AB:P_AB + 1, :H]
    sos_ih = p_ref[P_SOS:P_SOS + 1, :H]
    b_s = p_ref[P_BS:P_BS + 1, :H]
    bout = p_ref[P_BOUT:P_BOUT + 1, :V]
    wcat = p_ref[P_WCAT:P_WCAT + H, :V + H]                     # [W_out | W_hh]
    efcat = p_ref[P_EFCAT:P_EFCAT + V, :H + HR]                 # [ef | efr]
    whhr = p_ref[P_WHHR:P_WHHR + HR, :HR]
    b_r = p_ref[P_BR:P_BR + 1, :HR]
    awr = p_ref[P_AWR:P_AWR + HR, :F]
    abr = p_ref[P_ABR:P_ABR + 1, :F]

    # hoist loop-invariant broadcasts / iotas (JAX does not CSE broadcast_in_dim)
    bs_b = jnp.broadcast_to(b_s, (B, H))
    br_b = jnp.broadcast_to(b_r, (B, HR))
    bout_b = jnp.broadcast_to(bout, (B, V))
    vidx = lax.broadcasted_iota(jnp.int32, (B, V), 1)

    # ---- sender init: prev_hidden = agent(sender_input), first input = sos embedding ----
    h0 = jnp.dot(x, aw, preferred_element_type=jnp.float32) + ab            # (B, H)
    rec_pre = jnp.dot(h0, wcat, preferred_element_type=jnp.float32)[:, V:]  # h0 @ W_hh
    eh_s = jnp.broadcast_to(sos_ih, (B, H))                                 # W_ih @ sos

    # ---- receiver init ----
    h_r = jnp.zeros((B, HR), jnp.float32)
    enc = jnp.zeros((B, HR), jnp.float32)

    # ---- REINFORCE running accumulators ----
    alive = jnp.ones((B, 1), jnp.float32)            # 1.0 iff t < message_length
    eff_logp = jnp.zeros((B, 1), jnp.float32)
    eff_ent = jnp.zeros((B, 1), jnp.float32)
    length_f = jnp.zeros((B, 1), jnp.float32)
    sym_cols = []
    ent_cols = []

    for t in range(MAX_LEN):
        # sender RNN cell:  h = tanh(W_ih e + W_hh h + b)   (embedding pre-folded)
        h_s = jnp.tanh(eh_s + rec_pre + bs_b)
        # ONE matmul gives both this step's logits and next step's recurrent pre-activation
        hw = jnp.dot(h_s, wcat, preferred_element_type=jnp.float32)         # (B, V+H)
        logits = hw[:, :V] + bout_b
        rec_pre = hw[:, V:]

        mx = jnp.max(logits, axis=-1, keepdims=True)
        shifted = logits - mx
        z = jnp.exp(shifted)
        s = jnp.sum(z, axis=-1, keepdims=True)
        log_s = jnp.log(s)
        # entropy = log(s) - sum(z * shifted) / s   (no explicit softmax / log-softmax)
        ent_t = log_s - jnp.sum(z * shifted, axis=-1, keepdims=True) / s    # (B, 1)
        # greedy (eval-mode) argmax; its log-prob is max(logits) - logsumexp = -log(s)
        chosen_logp = -log_s                                                 # (B, 1)
        sym = jnp.min(jnp.where(logits >= mx, vidx, V), axis=-1, keepdims=True)  # (B,1) i32
        onehot = (vidx == sym).astype(jnp.float32)                           # (B, V)

        # masked time accumulations (t < length  <=>  no eos emitted before step t)
        eff_logp = eff_logp + chosen_logp * alive
        eff_ent = eff_ent + ent_t * alive
        length_f = length_f + alive
        sym_cols.append(sym)
        ent_cols.append(ent_t)

        # ONE embedding matmul feeds both sender-next-input and receiver-input
        ecat = jnp.dot(onehot, efcat, preferred_element_type=jnp.float32)    # (B, H+HR)
        eh_s = ecat[:, :H]
        eh_r = ecat[:, H:]
        h_r = jnp.tanh(eh_r + jnp.dot(h_r, whhr, preferred_element_type=jnp.float32) + br_b)

        # pack_padded_sequence semantics: keep the hidden state at position message_length - 1
        is_last = (alive > 0.5) & (sym == 0)
        enc = jnp.where(is_last, h_r, enc)
        alive = alive * (sym != 0).astype(jnp.float32)

    # forced eos column (t == MAX_LEN, symbol 0 for everyone): counts toward length if no earlier
    # eos; the receiver still consumes it (embedding row 0); logp/entropy columns stay zero.
    length_f = length_f + alive
    eh_r0 = jnp.broadcast_to(efcat[0:1, H:], (B, HR))
    h_r = jnp.tanh(eh_r0 + jnp.dot(h_r, whhr, preferred_element_type=jnp.float32) + br_b)
    enc = jnp.where(alive > 0.5, h_r, enc)

    # receiver agent head: Linear(HR -> F)
    ro = jnp.dot(enc, awr, preferred_element_type=jnp.float32) + abr         # (B, F)

    # ------------------ mechanics: MSE loss + REINFORCE objective -------------------
    diff = x - ro
    loss = jnp.mean(diff * diff, axis=1, keepdims=True)                      # (B, 1)

    eff_ent_n = eff_ent / length_f
    # receiver is deterministic: entropy_r == 0 and log_prob_r == 0, so those terms vanish.
    weighted_entropy = jnp.mean(eff_ent_n, axis=0, keepdims=True) * SENDER_ENTROPY_COEFF
    length_loss = length_f * LENGTH_COST
    policy_length_loss = jnp.mean((length_loss - BASELINE_LENGTH) * eff_logp,
                                  axis=0, keepdims=True)
    policy_loss = jnp.mean((loss - BASELINE_LOSS) * eff_logp, axis=0, keepdims=True)
    loss_mean = jnp.mean(loss, axis=0, keepdims=True)
    opt = policy_length_loss + policy_loss - weighted_entropy + loss_mean    # (1, 1)

    # ----- pack everything into one lane-dense (B, 128) slab: single unmasked store -----
    zero_col = jnp.zeros((B, 1), jnp.float32)
    ent_full = jnp.concatenate(ent_cols + [zero_col], axis=1)                # (B, T)
    msg_f = jnp.concatenate([c.astype(jnp.float32) for c in sym_cols] + [zero_col],
                            axis=1)                                          # (B, T) exact ints
    slab = jnp.concatenate(
        [jnp.broadcast_to(opt, (B, 1)), loss, length_f, ro, ent_full, msg_f,
         jnp.zeros((B, OUT_LANES - _USED_LANES), jnp.float32)], axis=1)
    out_ref[...] = slab


# approximate cost for XLA's scheduler (the kernel is microsecond-scale)
_FLOPS = int(2 * B * F * H + 2 * B * H * (V + H)
             + MAX_LEN * 2 * B * (H * (V + H) + V * (H + HR) + HR * HR)
             + 2 * B * HR * HR + 2 * B * HR * F)
_TRANS = int(MAX_LEN * B * (H + V + HR + 2) + B * HR)
_BYTES = int(4 * (B * F + PACK_ROWS * PACK_LANES + B * OUT_LANES))


def run_game(x, pack):
    return pl.pallas_call(
        _game_kernel,
        out_shape=jax.ShapeDtypeStruct((B, OUT_LANES), jnp.float32),
        in_specs=[_VMEM(), _VMEM()],
        out_specs=_VMEM(),
        cost_estimate=pl.CostEstimate(flops=_FLOPS, transcendentals=_TRANS,
                                      bytes_accessed=_BYTES),
    )(x, pack)


# --------------------------------- glue (JAX) ------------------------------------
def init_params(key):
    ks = jax.random.split(key, 10)
    s = 0.1
    sender = (
        jax.random.normal(ks[0], (F, H), jnp.float32) * s,    # agent Linear(F, H) weight
        jnp.zeros((1, H), jnp.float32),                       # agent bias
        jax.random.normal(ks[1], (1, E), jnp.float32) * s,    # sos embedding
        jax.random.normal(ks[2], (V, E), jnp.float32) * s,    # symbol embedding
        jax.random.normal(ks[3], (E, H), jnp.float32) * s,    # RNNCell W_ih
        jnp.zeros((1, H), jnp.float32),                       # b_ih
        jax.random.normal(ks[4], (H, H), jnp.float32) * s,    # RNNCell W_hh
        jnp.zeros((1, H), jnp.float32),                       # b_hh
        jax.random.normal(ks[5], (H, V), jnp.float32) * s,    # hidden_to_output
        jnp.zeros((1, V), jnp.float32),
    )
    receiver = (
        jax.random.normal(ks[6], (V, ER), jnp.float32) * s,   # embedding
        jax.random.normal(ks[7], (ER, HR), jnp.float32) * s,  # RNNCell W_ih
        jnp.zeros((1, HR), jnp.float32),
        jax.random.normal(ks[8], (HR, HR), jnp.float32) * s,  # RNNCell W_hh
        jnp.zeros((1, HR), jnp.float32),
        jax.random.normal(ks[9], (HR, F), jnp.float32) * s,   # agent Linear(HR, F)
        jnp.zeros((1, F), jnp.float32),
    )
    return {"sender": sender, "receiver": receiver}


def pack_params(params):
    """One-time host-side folding + packing of all parameters into one (168, 64) buffer."""
    aw, ab, sos, emb, wih, bih, whh, bhh, wout, bout = params["sender"]
    embr, wihr, bihr, whhr, bhhr, awr, abr = params["receiver"]
    sos_ih = sos @ wih                               # (1, H)   sos embedding folded through W_ih
    ef = emb @ wih                                   # (V, H)   symbol embedding folded
    b_s = bih + bhh                                  # (1, H)
    efr = embr @ wihr                                # (V, HR)
    b_r = bihr + bhhr                                # (1, HR)
    wcat = jnp.concatenate([wout, whh], axis=1)      # (H, V+H)  fused [output | recurrence]
    efcat = jnp.concatenate([ef, efr], axis=1)       # (V, H+HR) fused embedding table

    pack = jnp.zeros((PACK_ROWS, PACK_LANES), jnp.float32)

    def put(buf, off, a):
        return buf.at[off:off + a.shape[0], :a.shape[1]].set(a)

    pack = put(pack, P_AW, aw)
    pack = put(pack, P_AB, ab)
    pack = put(pack, P_SOS, sos_ih)
    pack = put(pack, P_BS, b_s)
    pack = put(pack, P_BOUT, bout)
    pack = put(pack, P_WCAT, wcat)
    pack = put(pack, P_EFCAT, efcat)
    pack = put(pack, P_WHHR, whhr)
    pack = put(pack, P_BR, b_r)
    pack = put(pack, P_AWR, awr)
    pack = put(pack, P_ABR, abr)
    return pack


@jax.jit
def game_forward(sender_input, pack):
    # ErasureChannel(erasure_pr=0.0, apply_noise=False) -> identity on 2-D messages.
    slab = run_game(sender_input, pack)
    opt = slab[0, COL_OPT]
    aux = {
        "loss": slab[:, COL_LOSS],
        "length": slab[:, COL_LEN],
        "receiver_output": slab[:, COL_RO:COL_RO + F],
        "sender_entropy": slab[:, COL_ENT:COL_ENT + T],
        "receiver_entropy": jnp.zeros((B,), jnp.float32),
        "message": slab[:, COL_MSG:COL_MSG + T].astype(jnp.int32),
    }
    return opt, aux


if __name__ == "__main__":
    key = jax.random.PRNGKey(0)
    k_params, k_x = jax.random.split(key)
    params = init_params(k_params)
    pack = pack_params(params)
    sender_input = jax.random.normal(k_x, (B, F), jnp.float32)

    optimized_loss, aux = game_forward(sender_input, pack)
    jax.block_until_ready(optimized_loss)
    print("KERNEL_OK")
</pallas_src>

<mosaic_0001>
module attributes {stable_mosaic.version = 11 : i64} {
  func.func @_game_kernel(%arg0: memref<8x4xf32, #tpu.memory_space<vmem>>, %arg1: memref<168x64xf32, #tpu.memory_space<vmem>>, %arg2: memref<8x128xf32, #tpu.memory_space<vmem>>) attributes {dimension_semantics = [], scalar_prefetch = 0 : i64, scratch_operands = 0 : i64, tpu.core_type = #tpu.core_type<tc>} {
    %c0 = arith.constant 0 : index
    %c0_0 = arith.constant 0 : index
    %0 = vector.load %arg0[%c0, %c0_0] : memref<8x4xf32, #tpu.memory_space<vmem>>, vector<8x4xf32>
    %c0_1 = arith.constant 0 : index
    %c0_2 = arith.constant 0 : index
    %1 = vector.load %arg1[%c0_1, %c0_2] : memref<168x64xf32, #tpu.memory_space<vmem>>, vector<4x32xf32>
    %c8 = arith.constant 8 : index
    %c0_3 = arith.constant 0 : index
    %2 = vector.load %arg1[%c8, %c0_3] : memref<168x64xf32, #tpu.memory_space<vmem>>, vector<1x32xf32>
    %c16 = arith.constant 16 : index
    %c0_4 = arith.constant 0 : index
    %3 = vector.load %arg1[%c16, %c0_4] : memref<168x64xf32, #tpu.memory_space<vmem>>, vector<1x32xf32>
    %c24 = arith.constant 24 : index
    %c0_5 = arith.constant 0 : index
    %4 = vector.load %arg1[%c24, %c0_5] : memref<168x64xf32, #tpu.memory_space<vmem>>, vector<1x32xf32>
    %c32 = arith.constant 32 : index
    %c0_6 = arith.constant 0 : index
    %5 = vector.load %arg1[%c32, %c0_6] : memref<168x64xf32, #tpu.memory_space<vmem>>, vector<1x16xf32>
    %c40 = arith.constant 40 : index
    %c0_7 = arith.constant 0 : index
    %6 = vector.load %arg1[%c40, %c0_7] : memref<168x64xf32, #tpu.memory_space<vmem>>, vector<32x48xf32>
    %c72 = arith.constant 72 : index
    %c0_8 = arith.constant 0 : index
    %7 = vector.load %arg1[%c72, %c0_8] : memref<168x64xf32, #tpu.memory_space<vmem>>, vector<16x64xf32>
    %c88 = arith.constant 88 : index
    %c0_9 = arith.constant 0 : index
    %8 = vector.load %arg1[%c88, %c0_9] : memref<168x64xf32, #tpu.memory_space<vmem>>, vector<32x32xf32>
    %c120 = arith.constant 120 : index
    %c0_10 = arith.constant 0 : index
    %9 = vector.load %arg1[%c120, %c0_10] : memref<168x64xf32, #tpu.memory_space<vmem>>, vector<1x32xf32>
    %c128 = arith.constant 128 : index
    %c0_11 = arith.constant 0 : index
    %10 = vector.load %arg1[%c128, %c0_11] : memref<168x64xf32, #tpu.memory_space<vmem>>, vector<32x4xf32>
    %c160 = arith.constant 160 : index
    %c0_12 = arith.constant 0 : index
    %11 = vector.load %arg1[%c160, %c0_12] : memref<168x64xf32, #tpu.memory_space<vmem>>, vector<1x4xf32>
    %12 = vector.shape_cast %4 : vector<1x32xf32> to vector<1x32xf32>
    %13 = vector.broadcast %12 : vector<1x32xf32> to vector<8x32xf32>
    %14 = vector.shape_cast %9 : vector<1x32xf32> to vector<1x32xf32>
    %15 = vector.broadcast %14 : vector<1x32xf32> to vector<8x32xf32>
    %16 = vector.shape_cast %5 : vector<1x16xf32> to vector<1x16xf32>
    %17 = vector.broadcast %16 : vector<1x16xf32> to vector<8x16xf32>
    %18 = tpu.iota {dimensions = array<i32: 1>} : vector<8x16xi32>
    %cst = arith.constant dense<0.000000e+00> : vector<8x32xf32>
    %19 = tpu.matmul %0, %1, %cst {dimension_numbers = #tpu.dot_dimension_numbers<[1], [0], [0], [1], [0, 0, 1, 1], [], []>} : vector<8x4xf32>, vector<4x32xf32>, vector<8x32xf32> -> vector<8x32xf32>
    %20 = vector.broadcast %2 : vector<1x32xf32> to vector<8x32xf32>
    %21 = arith.addf %19, %20 : vector<8x32xf32>
    %cst_13 = arith.constant dense<0.000000e+00> : vector<8x48xf32>
    %22 = tpu.matmul %21, %6, %cst_13 {dimension_numbers = #tpu.dot_dimension_numbers<[1], [0], [0], [1], [0, 0, 1, 1], [], []>} : vector<8x32xf32>, vector<32x48xf32>, vector<8x48xf32> -> vector<8x48xf32>
    %23 = vector.extract_strided_slice %22 {offsets = [0, 16], sizes = [8, 32], strides = [1, 1]} : vector<8x48xf32> to vector<8x32xf32>
    %24 = vector.shape_cast %3 : vector<1x32xf32> to vector<1x32xf32>
    %25 = vector.broadcast %24 : vector<1x32xf32> to vector<8x32xf32>
    %cst_14 = arith.constant 0.000000e+00 : f32
    %26 = vector.broadcast %cst_14 : f32 to vector<8x32xf32>
    %cst_15 = arith.constant 0.000000e+00 : f32
    %27 = vector.broadcast %cst_15 : f32 to vector<8x32xf32>
    %cst_16 = arith.constant 1.000000e+00 : f32
    %28 = vector.broadcast %cst_16 : f32 to vector<8x1xf32>
    %cst_17 = arith.constant 0.000000e+00 : f32
    %29 = vector.broadcast %cst_17 : f32 to vector<8x1xf32>
    %cst_18 = arith.constant 0.000000e+00 : f32
    %30 = vector.broadcast %cst_18 : f32 to vector<8x1xf32>
    %cst_19 = arith.constant 0.000000e+00 : f32
    %31 = vector.broadcast %cst_19 : f32 to vector<8x1xf32>
    %32 = arith.addf %25, %23 : vector<8x32xf32>
    %33 = arith.addf %32, %13 : vector<8x32xf32>
    %34 = math.tanh %33 : vector<8x32xf32>
    %cst_20 = arith.constant dense<0.000000e+00> : vector<8x48xf32>
    %35 = tpu.matmul %34, %6, %cst_20 {dimension_numbers = #tpu.dot_dimension_numbers<[1], [0], [0], [1], [0, 0, 1, 1], [], []>} : vector<8x32xf32>, vector<32x48xf32>, vector<8x48xf32> -> vector<8x48xf32>
    %36 = vector.extract_strided_slice %35 {offsets = [0, 0], sizes = [8, 16], strides = [1, 1]} : vector<8x48xf32> to vector<8x16xf32>
    %37 = arith.addf %36, %17 : vector<8x16xf32>
    %38 = vector.extract_strided_slice %35 {offsets = [0, 16], sizes = [8, 32], strides = [1, 1]} : vector<8x48xf32> to vector<8x32xf32>
    %cst_21 = arith.constant dense<0xFF800000> : vector<8xf32>
    %39 = vector.multi_reduction <maximumf>, %37, %cst_21 [1] : vector<8x16xf32> to vector<8xf32>
    %40 = vector.shape_cast %39 : vector<8xf32> to vector<8x1xf32>
    %41 = vector.broadcast %40 : vector<8x1xf32> to vector<8x16xf32>
    %42 = arith.subf %37, %41 : vector<8x16xf32>
    %43 = math.exp %42 : vector<8x16xf32>
    %cst_22 = arith.constant dense<0.000000e+00> : vector<8xf32>
    %44 = vector.multi_reduction <add>, %43, %cst_22 [1] : vector<8x16xf32> to vector<8xf32>
    %45 = vector.shape_cast %44 : vector<8xf32> to vector<8x1xf32>
    %46 = math.log %45 : vector<8x1xf32>
    %47 = arith.mulf %43, %42 : vector<8x16xf32>
    %cst_23 = arith.constant dense<0.000000e+00> : vector<8xf32>
    %48 = vector.multi_reduction <add>, %47, %cst_23 [1] : vector<8x16xf32> to vector<8xf32>
    %49 = vector.shape_cast %48 : vector<8xf32> to vector<8x1xf32>
    %50 = arith.divf %49, %45 : vector<8x1xf32>
    %51 = arith.subf %46, %50 : vector<8x1xf32>
    %cst_24 = arith.constant 0.000000e+00 : f32
    %52 = vector.broadcast %cst_24 : f32 to vector<8x1xf32>
    %53 = arith.subf %52, %46 : vector<8x1xf32>
    %54 = vector.broadcast %40 : vector<8x1xf32> to vector<8x16xf32>
    %55 = arith.cmpf oge, %37, %54 : vector<8x16xf32>
    %c16_i32 = arith.constant 16 : i32
    %56 = vector.broadcast %c16_i32 : i32 to vector<8x16xi32>
    %57 = arith.select %55, %18, %56 : vector<8x16xi1>, vector<8x16xi32>
    %cst_25 = arith.constant dense<2147483647> : vector<8xi32>
    %58 = vector.multi_reduction <minsi>, %57, %cst_25 [1] : vector<8x16xi32> to vector<8xi32>
    %59 = vector.shape_cast %58 : vector<8xi32> to vector<8x1xi32>
    %60 = vector.broadcast %59 : vector<8x1xi32> to vector<8x16xi32>
    %61 = arith.cmpi eq, %18, %60 : vector<8x16xi32>
    %62 = arith.extui %61 : vector<8x16xi1> to vector<8x16xi32>
    %63 = arith.sitofp %62 : vector<8x16xi32> to vector<8x16xf32>
    %64 = arith.mulf %53, %28 : vector<8x1xf32>
    %65 = arith.addf %29, %64 : vector<8x1xf32>
    %66 = arith.mulf %51, %28 : vector<8x1xf32>
    %67 = arith.addf %30, %66 : vector<8x1xf32>
    %68 = arith.addf %31, %28 : vector<8x1xf32>
    %cst_26 = arith.constant dense<0.000000e+00> : vector<8x64xf32>
    %69 = tpu.matmul %63, %7, %cst_26 {dimension_numbers = #tpu.dot_dimension_numbers<[1], [0], [0], [1], [0, 0, 1, 1], [], []>} : vector<8x16xf32>, vector<16x64xf32>, vector<8x64xf32> -> vector<8x64xf32>
    %70 = vector.extract_strided_slice %69 {offsets = [0, 0], sizes = [8, 32], strides = [1, 1]} : vector<8x64xf32> to vector<8x32xf32>
    %71 = vector.extract_strided_slice %69 {offsets = [0, 32], sizes = [8, 32], strides = [1, 1]} : vector<8x64xf32> to vector<8x32xf32>
    %cst_27 = arith.constant dense<0.000000e+00> : vector<8x32xf32>
    %72 = tpu.matmul %26, %8, %cst_27 {dimension_numbers = #tpu.dot_dimension_numbers<[1], [0], [0], [1], [0, 0, 1, 1], [], []>} : vector<8x32xf32>, vector<32x32xf32>, vector<8x32xf32> -> vector<8x32xf32>
    %73 = arith.addf %71, %72 : vector<8x32xf32>
    %74 = arith.addf %73, %15 : vector<8x32xf32>
    %75 = math.tanh %74 : vector<8x32xf32>
    %cst_28 = arith.constant 5.000000e-01 : f32
    %76 = vector.broadcast %cst_28 : f32 to vector<8x1xf32>
    %77 = arith.cmpf ogt, %28, %76 : vector<8x1xf32>
    %c0_i32 = arith.constant 0 : i32
    %78 = vector.broadcast %c0_i32 : i32 to vector<8x1xi32>
    %79 = arith.cmpi eq, %59, %78 : vector<8x1xi32>
    %80 = arith.andi %77, %79 : vector<8x1xi1>
    %81 = vector.shape_cast %80 : vector<8x1xi1> to vector<8x1xi1>
    %82 = vector.broadcast %81 : vector<8x1xi1> to vector<8x32xi1>
    %83 = arith.select %82, %75, %27 : vector<8x32xi1>, vector<8x32xf32>
    %c0_i32_29 = arith.constant 0 : i32
    %84 = vector.broadcast %c0_i32_29 : i32 to vector<8x1xi32>
    %85 = arith.cmpi ne, %59, %84 : vector<8x1xi32>
    %86 = arith.extui %85 : vector<8x1xi1> to vector<8x1xi32>
    %87 = arith.sitofp %86 : vector<8x1xi32> to vector<8x1xf32>
    %88 = arith.mulf %28, %87 : vector<8x1xf32>
    %89 = arith.addf %70, %38 : vector<8x32xf32>
    %90 = arith.addf %89, %13 : vector<8x32xf32>
    %91 = math.tanh %90 : vector<8x32xf32>
    %cst_30 = arith.constant dense<0.000000e+00> : vector<8x48xf32>
    %92 = tpu.matmul %91, %6, %cst_30 {dimension_numbers = #tpu.dot_dimension_numbers<[1], [0], [0], [1], [0, 0, 1, 1], [], []>} : vector<8x32xf32>, vector<32x48xf32>, vector<8x48xf32> -> vector<8x48xf32>
    %93 = vector.extract_strided_slice %92 {offsets = [0, 0], sizes = [8, 16], strides = [1, 1]} : vector<8x48xf32> to vector<8x16xf32>
    %94 = arith.addf %93, %17 : vector<8x16xf32>
    %95 = vector.extract_strided_slice %92 {offsets = [0, 16], sizes = [8, 32], strides = [1, 1]} : vector<8x48xf32> to vector<8x32xf32>
    %cst_31 = arith.constant dense<0xFF800000> : vector<8xf32>
    %96 = vector.multi_reduction <maximumf>, %94, %cst_31 [1] : vector<8x16xf32> to vector<8xf32>
    %97 = vector.shape_cast %96 : vector<8xf32> to vector<8x1xf32>
    %98 = vector.broadcast %97 : vector<8x1xf32> to vector<8x16xf32>
    %99 = arith.subf %94, %98 : vector<8x16xf32>
    %100 = math.exp %99 : vector<8x16xf32>
    %cst_32 = arith.constant dense<0.000000e+00> : vector<8xf32>
    %101 = vector.multi_reduction <add>, %100, %cst_32 [1] : vector<8x16xf32> to vector<8xf32>
    %102 = vector.shape_cast %101 : vector<8xf32> to vector<8x1xf32>
    %103 = math.log %102 : vector<8x1xf32>
    %104 = arith.mulf %100, %99 : vector<8x16xf32>
    %cst_33 = arith.constant dense<0.000000e+00> : vector<8xf32>
    %105 = vector.multi_reduction <add>, %104, %cst_33 [1] : vector<8x16xf32> to vector<8xf32>
    %106 = vector.shape_cast %105 : vector<8xf32> to vector<8x1xf32>
    %107 = arith.divf %106, %102 : vector<8x1xf32>
    %108 = arith.subf %103, %107 : vector<8x1xf32>
    %cst_34 = arith.constant 0.000000e+00 : f32
    %109 = vector.broadcast %cst_34 : f32 to vector<8x1xf32>
    %110 = arith.subf %109, %103 : vector<8x1xf32>
    %111 = vector.broadcast %97 : vector<8x1xf32> to vector<8x16xf32>
    %112 = arith.cmpf oge, %94, %111 : vector<8x16xf32>
    %c16_i32_35 = arith.constant 16 : i32
    %113 = vector.broadcast %c16_i32_35 : i32 to vector<8x16xi32>
    %114 = arith.select %112, %18, %113 : vector<8x16xi1>, vector<8x16xi32>
    %cst_36 = arith.constant dense<2147483647> : vector<8xi32>
    %115 = vector.multi_reduction <minsi>, %114, %cst_36 [1] : vector<8x16xi32> to vector<8xi32>
    %116 = vector.shape_cast %115 : vector<8xi32> to vector<8x1xi32>
    %117 = vector.broadcast %116 : vector<8x1xi32> to vector<8x16xi32>
    %118 = arith.cmpi eq, %18, %117 : vector<8x16xi32>
    %119 = arith.extui %118 : vector<8x16xi1> to vector<8x16xi32>
    %120 = arith.sitofp %119 : vector<8x16xi32> to vector<8x16xf32>
    %121 = arith.mulf %110, %88 : vector<8x1xf32>
    %122 = arith.addf %65, %121 : vector<8x1xf32>
    %123 = arith.mulf %108, %88 : vector<8x1xf32>
    %124 = arith.addf %67, %123 : vector<8x1xf32>
    %125 = arith.addf %68, %88 : vector<8x1xf32>
    %cst_37 = arith.constant dense<0.000000e+00> : vector<8x64xf32>
    %126 = tpu.matmul %120, %7, %cst_37 {dimension_numbers = #tpu.dot_dimension_numbers<[1], [0], [0], [1], [0, 0, 1, 1], [], []>} : vector<8x16xf32>, vector<16x64xf32>, vector<8x64xf32> -> vector<8x64xf32>
    %127 = vector.extract_strided_slice %126 {offsets = [0, 0], sizes = [8, 32], strides = [1, 1]} : vector<8x64xf32> to vector<8x32xf32>
    %128 = vector.extract_strided_slice %126 {offsets = [0, 32], sizes = [8, 32], strides = [1, 1]} : vector<8x64xf32> to vector<8x32xf32>
    %cst_38 = arith.constant dense<0.000000e+00> : vector<8x32xf32>
    %129 = tpu.matmul %75, %8, %cst_38 {dimension_numbers = #tpu.dot_dimension_numbers<[1], [0], [0], [1], [0, 0, 1, 1], [], []>} : vector<8x32xf32>, vector<32x32xf32>, vector<8x32xf32> -> vector<8x32xf32>
    %130 = arith.addf %128, %129 : vector<8x32xf32>
    %131 = arith.addf %130, %15 : vector<8x32xf32>
    %132 = math.tanh %131 : vector<8x32xf32>
    %cst_39 = arith.constant 5.000000e-01 : f32
    %133 = vector.broadcast %cst_39 : f32 to vector<8x1xf32>
    %134 = arith.cmpf ogt, %88, %133 : vector<8x1xf32>
    %c0_i32_40 = arith.constant 0 : i32
    %135 = vector.broadcast %c0_i32_40 : i32 to vector<8x1xi32>
    %136 = arith.cmpi eq, %116, %135 : vector<8x1xi32>
    %137 = arith.andi %134, %136 : vector<8x1xi1>
    %138 = vector.shape_cast %137 : vector<8x1xi1> to vector<8x1xi1>
    %139 = vector.broadcast %138 : vector<8x1xi1> to vector<8x32xi1>
    %140 = arith.select %139, %132, %83 : vector<8x32xi1>, vector<8x32xf32>
    %c0_i32_41 = arith.constant 0 : i32
    %141 = vector.broadcast %c0_i32_41 : i32 to vector<8x1xi32>
    %142 = arith.cmpi ne, %116, %141 : vector<8x1xi32>
    %143 = arith.extui %142 : vector<8x1xi1> to vector<8x1xi32>
    %144 = arith.sitofp %143 : vector<8x1xi32> to vector<8x1xf32>
    %145 = arith.mulf %88, %144 : vector<8x1xf32>
    %146 = arith.addf %127, %95 : vector<8x32xf32>
    %147 = arith.addf %146, %13 : vector<8x32xf32>
    %148 = math.tanh %147 : vector<8x32xf32>
    %cst_42 = arith.constant dense<0.000000e+00> : vector<8x48xf32>
    %149 = tpu.matmul %148, %6, %cst_42 {dimension_numbers = #tpu.dot_dimension_numbers<[1], [0], [0], [1], [0, 0, 1, 1], [], []>} : vector<8x32xf32>, vector<32x48xf32>, vector<8x48xf32> -> vector<8x48xf32>
    %150 = vector.extract_strided_slice %149 {offsets = [0, 0], sizes = [8, 16], strides = [1, 1]} : vector<8x48xf32> to vector<8x16xf32>
    %151 = arith.addf %150, %17 : vector<8x16xf32>
    %152 = vector.extract_strided_slice %149 {offsets = [0, 16], sizes = [8, 32], strides = [1, 1]} : vector<8x48xf32> to vector<8x32xf32>
    %cst_43 = arith.constant dense<0xFF800000> : vector<8xf32>
    %153 = vector.multi_reduction <maximumf>, %151, %cst_43 [1] : vector<8x16xf32> to vector<8xf32>
    %154 = vector.shape_cast %153 : vector<8xf32> to vector<8x1xf32>
    %155 = vector.broadcast %154 : vector<8x1xf32> to vector<8x16xf32>
    %156 = arith.subf %151, %155 : vector<8x16xf32>
    %157 = math.exp %156 : vector<8x16xf32>
    %cst_44 = arith.constant dense<0.000000e+00> : vector<8xf32>
    %158 = vector.multi_reduction <add>, %157, %cst_44 [1] : vector<8x16xf32> to vector<8xf32>
    %159 = vector.shape_cast %158 : vector<8xf32> to vector<8x1xf32>
    %160 = math.log %159 : vector<8x1xf32>
    %161 = arith.mulf %157, %156 : vector<8x16xf32>
    %cst_45 = arith.constant dense<0.000000e+00> : vector<8xf32>
    %162 = vector.multi_reduction <add>, %161, %cst_45 [1] : vector<8x16xf32> to vector<8xf32>
    %163 = vector.shape_cast %162 : vector<8xf32> to vector<8x1xf32>
    %164 = arith.divf %163, %159 : vector<8x1xf32>
    %165 = arith.subf %160, %164 : vector<8x1xf32>
    %cst_46 = arith.constant 0.000000e+00 : f32
    %166 = vector.broadcast %cst_46 : f32 to vector<8x1xf32>
    %167 = arith.subf %166, %160 : vector<8x1xf32>
    %168 = vector.broadcast %154 : vector<8x1xf32> to vector<8x16xf32>
    %169 = arith.cmpf oge, %151, %168 : vector<8x16xf32>
    %c16_i32_47 = arith.constant 16 : i32
    %170 = vector.broadcast %c16_i32_47 : i32 to vector<8x16xi32>
    %171 = arith.select %169, %18, %170 : vector<8x16xi1>, vector<8x16xi32>
    %cst_48 = arith.constant dense<2147483647> : vector<8xi32>
    %172 = vector.multi_reduction <minsi>, %171, %cst_48 [1] : vector<8x16xi32> to vector<8xi32>
    %173 = vector.shape_cast %172 : vector<8xi32> to vector<8x1xi32>
    %174 = vector.broadcast %173 : vector<8x1xi32> to vector<8x16xi32>
    %175 = arith.cmpi eq, %18, %174 : vector<8x16xi32>
    %176 = arith.extui %175 : vector<8x16xi1> to vector<8x16xi32>
    %177 = arith.sitofp %176 : vector<8x16xi32> to vector<8x16xf32>
    %178 = arith.mulf %167, %145 : vector<8x1xf32>
    %179 = arith.addf %122, %178 : vector<8x1xf32>
    %180 = arith.mulf %165, %145 : vector<8x1xf32>
    %181 = arith.addf %124, %180 : vector<8x1xf32>
    %182 = arith.addf %125, %145 : vector<8x1xf32>
    %cst_49 = arith.constant dense<0.000000e+00> : vector<8x64xf32>
    %183 = tpu.matmul %177, %7, %cst_49 {dimension_numbers = #tpu.dot_dimension_numbers<[1], [0], [0], [1], [0, 0, 1, 1], [], []>} : vector<8x16xf32>, vector<16x64xf32>, vector<8x64xf32> -> vector<8x64xf32>
    %184 = vector.extract_strided_slice %183 {offsets = [0, 0], sizes = [8, 32], strides = [1, 1]} : vector<8x64xf32> to vector<8x32xf32>
    %185 = vector.extract_strided_slice %183 {offsets = [0, 32], sizes = [8, 32], strides = [1, 1]} : vector<8x64xf32> to vector<8x32xf32>
    %cst_50 = arith.constant dense<0.000000e+00> : vector<8x32xf32>
    %186 = tpu.matmul %132, %8, %cst_50 {dimension_numbers = #tpu.dot_dimension_numbers<[1], [0], [0], [1], [0, 0, 1, 1], [], []>} : vector<8x32xf32>, vector<32x32xf32>, vector<8x32xf32> -> vector<8x32xf32>
    %187 = arith.addf %185, %186 : vector<8x32xf32>
    %188 = arith.addf %187, %15 : vector<8x32xf32>
    %189 = math.tanh %188 : vector<8x32xf32>
    %cst_51 = arith.constant 5.000000e-01 : f32
    %190 = vector.broadcast %cst_51 : f32 to vector<8x1xf32>
    %191 = arith.cmpf ogt, %145, %190 : vector<8x1xf32>
    %c0_i32_52 = arith.constant 0 : i32
    %192 = vector.broadcast %c0_i32_52 : i32 to vector<8x1xi32>
    %193 = arith.cmpi eq, %173, %192 : vector<8x1xi32>
    %194 = arith.andi %191, %193 : vector<8x1xi1>
    %195 = vector.shape_cast %194 : vector<8x1xi1> to vector<8x1xi1>
    %196 = vector.broadcast %195 : vector<8x1xi1> to vector<8x32xi1>
    %197 = arith.select %196, %189, %140 : vector<8x32xi1>, vector<8x32xf32>
    %c0_i32_53 = arith.constant 0 : i32
    %198 = vector.broadcast %c0_i32_53 : i32 to vector<8x1xi32>
    %199 = arith.cmpi ne, %173, %198 : vector<8x1xi32>
    %200 = arith.extui %199 : vector<8x1xi1> to vector<8x1xi32>
    %201 = arith.sitofp %200 : vector<8x1xi32> to vector<8x1xf32>
    %202 = arith.mulf %145, %201 : vector<8x1xf32>
    %203 = arith.addf %184, %152 : vector<8x32xf32>
    %204 = arith.addf %203, %13 : vector<8x32xf32>
    %205 = math.tanh %204 : vector<8x32xf32>
    %cst_54 = arith.constant dense<0.000000e+00> : vector<8x48xf32>
    %206 = tpu.matmul %205, %6, %cst_54 {dimension_numbers = #tpu.dot_dimension_numbers<[1], [0], [0], [1], [0, 0, 1, 1], [], []>} : vector<8x32xf32>, vector<32x48xf32>, vector<8x48xf32> -> vector<8x48xf32>
    %207 = vector.extract_strided_slice %206 {offsets = [0, 0], sizes = [8, 16], strides = [1, 1]} : vector<8x48xf32> to vector<8x16xf32>
    %208 = arith.addf %207, %17 : vector<8x16xf32>
    %209 = vector.extract_strided_slice %206 {offsets = [0, 16], sizes = [8, 32], strides = [1, 1]} : vector<8x48xf32> to vector<8x32xf32>
    %cst_55 = arith.constant dense<0xFF800000> : vector<8xf32>
    %210 = vector.multi_reduction <maximumf>, %208, %cst_55 [1] : vector<8x16xf32> to vector<8xf32>
    %211 = vector.shape_cast %210 : vector<8xf32> to vector<8x1xf32>
    %212 = vector.broadcast %211 : vector<8x1xf32> to vector<8x16xf32>
    %213 = arith.subf %208, %212 : vector<8x16xf32>
    %214 = math.exp %213 : vector<8x16xf32>
    %cst_56 = arith.constant dense<0.000000e+00> : vector<8xf32>
    %215 = vector.multi_reduction <add>, %214, %cst_56 [1] : vector<8x16xf32> to vector<8xf32>
    %216 = vector.shape_cast %215 : vector<8xf32> to vector<8x1xf32>
    %217 = math.log %216 : vector<8x1xf32>
    %218 = arith.mulf %214, %213 : vector<8x16xf32>
    %cst_57 = arith.constant dense<0.000000e+00> : vector<8xf32>
    %219 = vector.multi_reduction <add>, %218, %cst_57 [1] : vector<8x16xf32> to vector<8xf32>
    %220 = vector.shape_cast %219 : vector<8xf32> to vector<8x1xf32>
    %221 = arith.divf %220, %216 : vector<8x1xf32>
    %222 = arith.subf %217, %221 : vector<8x1xf32>
    %cst_58 = arith.constant 0.000000e+00 : f32
    %223 = vector.broadcast %cst_58 : f32 to vector<8x1xf32>
    %224 = arith.subf %223, %217 : vector<8x1xf32>
    %225 = vector.broadcast %211 : vector<8x1xf32> to vector<8x16xf32>
    %226 = arith.cmpf oge, %208, %225 : vector<8x16xf32>
    %c16_i32_59 = arith.constant 16 : i32
    %227 = vector.broadcast %c16_i32_59 : i32 to vector<8x16xi32>
    %228 = arith.select %226, %18, %227 : vector<8x16xi1>, vector<8x16xi32>
    %cst_60 = arith.constant dense<2147483647> : vector<8xi32>
    %229 = vector.multi_reduction <minsi>, %228, %cst_60 [1] : vector<8x16xi32> to vector<8xi32>
    %230 = vector.shape_cast %229 : vector<8xi32> to vector<8x1xi32>
    %231 = vector.broadcast %230 : vector<8x1xi32> to vector<8x16xi32>
    %232 = arith.cmpi eq, %18, %231 : vector<8x16xi32>
    %233 = arith.extui %232 : vector<8x16xi1> to vector<8x16xi32>
    %234 = arith.sitofp %233 : vector<8x16xi32> to vector<8x16xf32>
    %235 = arith.mulf %224, %202 : vector<8x1xf32>
    %236 = arith.addf %179, %235 : vector<8x1xf32>
    %237 = arith.mulf %222, %202 : vector<8x1xf32>
    %238 = arith.addf %181, %237 : vector<8x1xf32>
    %239 = arith.addf %182, %202 : vector<8x1xf32>
    %cst_61 = arith.constant dense<0.000000e+00> : vector<8x64xf32>
    %240 = tpu.matmul %234, %7, %cst_61 {dimension_numbers = #tpu.dot_dimension_numbers<[1], [0], [0], [1], [0, 0, 1, 1], [], []>} : vector<8x16xf32>, vector<16x64xf32>, vector<8x64xf32> -> vector<8x64xf32>
    %241 = vector.extract_strided_slice %240 {offsets = [0, 0], sizes = [8, 32], strides = [1, 1]} : vector<8x64xf32> to vector<8x32xf32>
    %242 = vector.extract_strided_slice %240 {offsets = [0, 32], sizes = [8, 32], strides = [1, 1]} : vector<8x64xf32> to vector<8x32xf32>
    %cst_62 = arith.constant dense<0.000000e+00> : vector<8x32xf32>
    %243 = tpu.matmul %189, %8, %cst_62 {dimension_numbers = #tpu.dot_dimension_numbers<[1], [0], [0], [1], [0, 0, 1, 1], [], []>} : vector<8x32xf32>, vector<32x32xf32>, vector<8x32xf32> -> vector<8x32xf32>
    %244 = arith.addf %242, %243 : vector<8x32xf32>
    %245 = arith.addf %244, %15 : vector<8x32xf32>
    %246 = math.tanh %245 : vector<8x32xf32>
    %cst_63 = arith.constant 5.000000e-01 : f32
    %247 = vector.broadcast %cst_63 : f32 to vector<8x1xf32>
    %248 = arith.cmpf ogt, %202, %247 : vector<8x1xf32>
    %c0_i32_64 = arith.constant 0 : i32
    %249 = vector.broadcast %c0_i32_64 : i32 to vector<8x1xi32>
    %250 = arith.cmpi eq, %230, %249 : vector<8x1xi32>
    %251 = arith.andi %248, %250 : vector<8x1xi1>
    %252 = vector.shape_cast %251 : vector<8x1xi1> to vector<8x1xi1>
    %253 = vector.broadcast %252 : vector<8x1xi1> to vector<8x32xi1>
    %254 = arith.select %253, %246, %197 : vector<8x32xi1>, vector<8x32xf32>
    %c0_i32_65 = arith.constant 0 : i32
    %255 = vector.broadcast %c0_i32_65 : i32 to vector<8x1xi32>
    %256 = arith.cmpi ne, %230, %255 : vector<8x1xi32>
    %257 = arith.extui %256 : vector<8x1xi1> to vector<8x1xi32>
    %258 = arith.sitofp %257 : vector<8x1xi32> to vector<8x1xf32>
    %259 = arith.mulf %202, %258 : vector<8x1xf32>
    %260 = arith.addf %241, %209 : vector<8x32xf32>
    %261 = arith.addf %260, %13 : vector<8x32xf32>
    %262 = math.tanh %261 : vector<8x32xf32>
    %cst_66 = arith.constant dense<0.000000e+00> : vector<8x48xf32>
    %263 = tpu.matmul %262, %6, %cst_66 {dimension_numbers = #tpu.dot_dimension_numbers<[1], [0], [0], [1], [0, 0, 1, 1], [], []>} : vector<8x32xf32>, vector<32x48xf32>, vector<8x48xf32> -> vector<8x48xf32>
    %264 = vector.extract_strided_slice %263 {offsets = [0, 0], sizes = [8, 16], strides = [1, 1]} : vector<8x48xf32> to vector<8x16xf32>
    %265 = arith.addf %264, %17 : vector<8x16xf32>
    %266 = vector.extract_strided_slice %263 {offsets = [0, 16], sizes = [8, 32], strides = [1, 1]} : vector<8x48xf32> to vector<8x32xf32>
    %cst_67 = arith.constant dense<0xFF800000> : vector<8xf32>
    %267 = vector.multi_reduction <maximumf>, %265, %cst_67 [1] : vector<8x16xf32> to vector<8xf32>
    %268 = vector.shape_cast %267 : vector<8xf32> to vector<8x1xf32>
    %269 = vector.broadcast %268 : vector<8x1xf32> to vector<8x16xf32>
    %270 = arith.subf %265, %269 : vector<8x16xf32>
    %271 = math.exp %270 : vector<8x16xf32>
    %cst_68 = arith.constant dense<0.000000e+00> : vector<8xf32>
    %272 = vector.multi_reduction <add>, %271, %cst_68 [1] : vector<8x16xf32> to vector<8xf32>
    %273 = vector.shape_cast %272 : vector<8xf32> to vector<8x1xf32>
    %274 = math.log %273 : vector<8x1xf32>
    %275 = arith.mulf %271, %270 : vector<8x16xf32>
    %cst_69 = arith.constant dense<0.000000e+00> : vector<8xf32>
    %276 = vector.multi_reduction <add>, %275, %cst_69 [1] : vector<8x16xf32> to vector<8xf32>
    %277 = vector.shape_cast %276 : vector<8xf32> to vector<8x1xf32>
    %278 = arith.divf %277, %273 : vector<8x1xf32>
    %279 = arith.subf %274, %278 : vector<8x1xf32>
    %cst_70 = arith.constant 0.000000e+00 : f32
    %280 = vector.broadcast %cst_70 : f32 to vector<8x1xf32>
    %281 = arith.subf %280, %274 : vector<8x1xf32>
    %282 = vector.broadcast %268 : vector<8x1xf32> to vector<8x16xf32>
    %283 = arith.cmpf oge, %265, %282 : vector<8x16xf32>
    %c16_i32_71 = arith.constant 16 : i32
    %284 = vector.broadcast %c16_i32_71 : i32 to vector<8x16xi32>
    %285 = arith.select %283, %18, %284 : vector<8x16xi1>, vector<8x16xi32>
    %cst_72 = arith.constant dense<2147483647> : vector<8xi32>
    %286 = vector.multi_reduction <minsi>, %285, %cst_72 [1] : vector<8x16xi32> to vector<8xi32>
    %287 = vector.shape_cast %286 : vector<8xi32> to vector<8x1xi32>
    %288 = vector.broadcast %287 : vector<8x1xi32> to vector<8x16xi32>
    %289 = arith.cmpi eq, %18, %288 : vector<8x16xi32>
    %290 = arith.extui %289 : vector<8x16xi1> to vector<8x16xi32>
    %291 = arith.sitofp %290 : vector<8x16xi32> to vector<8x16xf32>
    %292 = arith.mulf %281, %259 : vector<8x1xf32>
    %293 = arith.addf %236, %292 : vector<8x1xf32>
    %294 = arith.mulf %279, %259 : vector<8x1xf32>
    %295 = arith.addf %238, %294 : vector<8x1xf32>
    %296 = arith.addf %239, %259 : vector<8x1xf32>
    %cst_73 = arith.constant dense<0.000000e+00> : vector<8x64xf32>
    %297 = tpu.matmul %291, %7, %cst_73 {dimension_numbers = #tpu.dot_dimension_numbers<[1], [0], [0], [1], [0, 0, 1, 1], [], []>} : vector<8x16xf32>, vector<16x64xf32>, vector<8x64xf32> -> vector<8x64xf32>
    %298 = vector.extract_strided_slice %297 {offsets = [0, 0], sizes = [8, 32], strides = [1, 1]} : vector<8x64xf32> to vector<8x32xf32>
    %299 = vector.extract_strided_slice %297 {offsets = [0, 32], sizes = [8, 32], strides = [1, 1]} : vector<8x64xf32> to vector<8x32xf32>
    %cst_74 = arith.constant dense<0.000000e+00> : vector<8x32xf32>
    %300 = tpu.matmul %246, %8, %cst_74 {dimension_numbers = #tpu.dot_dimension_numbers<[1], [0], [0], [1], [0, 0, 1, 1], [], []>} : vector<8x32xf32>, vector<32x32xf32>, vector<8x32xf32> -> vector<8x32xf32>
    %301 = arith.addf %299, %300 : vector<8x32xf32>
    %302 = arith.addf %301, %15 : vector<8x32xf32>
    %303 = math.tanh %302 : vector<8x32xf32>
    %cst_75 = arith.constant 5.000000e-01 : f32
    %304 = vector.broadcast %cst_75 : f32 to vector<8x1xf32>
    %305 = arith.cmpf ogt, %259, %304 : vector<8x1xf32>
    %c0_i32_76 = arith.constant 0 : i32
    %306 = vector.broadcast %c0_i32_76 : i32 to vector<8x1xi32>
    %307 = arith.cmpi eq, %287, %306 : vector<8x1xi32>
    %308 = arith.andi %305, %307 : vector<8x1xi1>
    %309 = vector.shape_cast %308 : vector<8x1xi1> to vector<8x1xi1>
    %310 = vector.broadcast %309 : vector<8x1xi1> to vector<8x32xi1>
    %311 = arith.select %310, %303, %254 : vector<8x32xi1>, vector<8x32xf32>
    %c0_i32_77 = arith.constant 0 : i32
    %312 = vector.broadcast %c0_i32_77 : i32 to vector<8x1xi32>
    %313 = arith.cmpi ne, %287, %312 : vector<8x1xi32>
    %314 = arith.extui %313 : vector<8x1xi1> to vector<8x1xi32>
    %315 = arith.sitofp %314 : vector<8x1xi32> to vector<8x1xf32>
    %316 = arith.mulf %259, %315 : vector<8x1xf32>
    %317 = arith.addf %298, %266 : vector<8x32xf32>
    %318 = arith.addf %317, %13 : vector<8x32xf32>
    %319 = math.tanh %318 : vector<8x32xf32>
    %cst_78 = arith.constant dense<0.000000e+00> : vector<8x48xf32>
    %320 = tpu.matmul %319, %6, %cst_78 {dimension_numbers = #tpu.dot_dimension_numbers<[1], [0], [0], [1], [0, 0, 1, 1], [], []>} : vector<8x32xf32>, vector<32x48xf32>, vector<8x48xf32> -> vector<8x48xf32>
    %321 = vector.extract_strided_slice %320 {offsets = [0, 0], sizes = [8, 16], strides = [1, 1]} : vector<8x48xf32> to vector<8x16xf32>
    %322 = arith.addf %321, %17 : vector<8x16xf32>
    %323 = vector.extract_strided_slice %320 {offsets = [0, 16], sizes = [8, 32], strides = [1, 1]} : vector<8x48xf32> to vector<8x32xf32>
    %cst_79 = arith.constant dense<0xFF800000> : vector<8xf32>
    %324 = vector.multi_reduction <maximumf>, %322, %cst_79 [1] : vector<8x16xf32> to vector<8xf32>
    %325 = vector.shape_cast %324 : vector<8xf32> to vector<8x1xf32>
    %326 = vector.broadcast %325 : vector<8x1xf32> to vector<8x16xf32>
    %327 = arith.subf %322, %326 : vector<8x16xf32>
    %328 = math.exp %327 : vector<8x16xf32>
    %cst_80 = arith.constant dense<0.000000e+00> : vector<8xf32>
    %329 = vector.multi_reduction <add>, %328, %cst_80 [1] : vector<8x16xf32> to vector<8xf32>
    %330 = vector.shape_cast %329 : vector<8xf32> to vector<8x1xf32>
    %331 = math.log %330 : vector<8x1xf32>
    %332 = arith.mulf %328, %327 : vector<8x16xf32>
    %cst_81 = arith.constant dense<0.000000e+00> : vector<8xf32>
    %333 = vector.multi_reduction <add>, %332, %cst_81 [1] : vector<8x16xf32> to vector<8xf32>
    %334 = vector.shape_cast %333 : vector<8xf32> to vector<8x1xf32>
    %335 = arith.divf %334, %330 : vector<8x1xf32>
    %336 = arith.subf %331, %335 : vector<8x1xf32>
    %cst_82 = arith.constant 0.000000e+00 : f32
    %337 = vector.broadcast %cst_82 : f32 to vector<8x1xf32>
    %338 = arith.subf %337, %331 : vector<8x1xf32>
    %339 = vector.broadcast %325 : vector<8x1xf32> to vector<8x16xf32>
    %340 = arith.cmpf oge, %322, %339 : vector<8x16xf32>
    %c16_i32_83 = arith.constant 16 : i32
    %341 = vector.broadcast %c16_i32_83 : i32 to vector<8x16xi32>
    %342 = arith.select %340, %18, %341 : vector<8x16xi1>, vector<8x16xi32>
    %cst_84 = arith.constant dense<2147483647> : vector<8xi32>
    %343 = vector.multi_reduction <minsi>, %342, %cst_84 [1] : vector<8x16xi32> to vector<8xi32>
    %344 = vector.shape_cast %343 : vector<8xi32> to vector<8x1xi32>
    %345 = vector.broadcast %344 : vector<8x1xi32> to vector<8x16xi32>
    %346 = arith.cmpi eq, %18, %345 : vector<8x16xi32>
    %347 = arith.extui %346 : vector<8x16xi1> to vector<8x16xi32>
    %348 = arith.sitofp %347 : vector<8x16xi32> to vector<8x16xf32>
    %349 = arith.mulf %338, %316 : vector<8x1xf32>
    %350 = arith.addf %293, %349 : vector<8x1xf32>
    %351 = arith.mulf %336, %316 : vector<8x1xf32>
    %352 = arith.addf %295, %351 : vector<8x1xf32>
    %353 = arith.addf %296, %316 : vector<8x1xf32>
    %cst_85 = arith.constant dense<0.000000e+00> : vector<8x64xf32>
    %354 = tpu.matmul %348, %7, %cst_85 {dimension_numbers = #tpu.dot_dimension_numbers<[1], [0], [0], [1], [0, 0, 1, 1], [], []>} : vector<8x16xf32>, vector<16x64xf32>, vector<8x64xf32> -> vector<8x64xf32>
    %355 = vector.extract_strided_slice %354 {offsets = [0, 0], sizes = [8, 32], strides = [1, 1]} : vector<8x64xf32> to vector<8x32xf32>
    %356 = vector.extract_strided_slice %354 {offsets = [0, 32], sizes = [8, 32], strides = [1, 1]} : vector<8x64xf32> to vector<8x32xf32>
    %cst_86 = arith.constant dense<0.000000e+00> : vector<8x32xf32>
    %357 = tpu.matmul %303, %8, %cst_86 {dimension_numbers = #tpu.dot_dimension_numbers<[1], [0], [0], [1], [0, 0, 1, 1], [], []>} : vector<8x32xf32>, vector<32x32xf32>, vector<8x32xf32> -> vector<8x32xf32>
    %358 = arith.addf %356, %357 : vector<8x32xf32>
    %359 = arith.addf %358, %15 : vector<8x32xf32>
    %360 = math.tanh %359 : vector<8x32xf32>
    %cst_87 = arith.constant 5.000000e-01 : f32
    %361 = vector.broadcast %cst_87 : f32 to vector<8x1xf32>
    %362 = arith.cmpf ogt, %316, %361 : vector<8x1xf32>
    %c0_i32_88 = arith.constant 0 : i32
    %363 = vector.broadcast %c0_i32_88 : i32 to vector<8x1xi32>
    %364 = arith.cmpi eq, %344, %363 : vector<8x1xi32>
    %365 = arith.andi %362, %364 : vector<8x1xi1>
    %366 = vector.shape_cast %365 : vector<8x1xi1> to vector<8x1xi1>
    %367 = vector.broadcast %366 : vector<8x1xi1> to vector<8x32xi1>
    %368 = arith.select %367, %360, %311 : vector<8x32xi1>, vector<8x32xf32>
    %c0_i32_89 = arith.constant 0 : i32
    %369 = vector.broadcast %c0_i32_89 : i32 to vector<8x1xi32>
    %370 = arith.cmpi ne, %344, %369 : vector<8x1xi32>
    %371 = arith.extui %370 : vector<8x1xi1> to vector<8x1xi32>
    %372 = arith.sitofp %371 : vector<8x1xi32> to vector<8x1xf32>
    %373 = arith.mulf %316, %372 : vector<8x1xf32>
    %374 = arith.addf %355, %323 : vector<8x32xf32>
    %375 = arith.addf %374, %13 : vector<8x32xf32>
    %376 = math.tanh %375 : vector<8x32xf32>
    %cst_90 = arith.constant dense<0.000000e+00> : vector<8x48xf32>
    %377 = tpu.matmul %376, %6, %cst_90 {dimension_numbers = #tpu.dot_dimension_numbers<[1], [0], [0], [1], [0, 0, 1, 1], [], []>} : vector<8x32xf32>, vector<32x48xf32>, vector<8x48xf32> -> vector<8x48xf32>
    %378 = vector.extract_strided_slice %377 {offsets = [0, 0], sizes = [8, 16], strides = [1, 1]} : vector<8x48xf32> to vector<8x16xf32>
    %379 = arith.addf %378, %17 : vector<8x16xf32>
    %cst_91 = arith.constant dense<0xFF800000> : vector<8xf32>
    %380 = vector.multi_reduction <maximumf>, %379, %cst_91 [1] : vector<8x16xf32> to vector<8xf32>
    %381 = vector.shape_cast %380 : vector<8xf32> to vector<8x1xf32>
    %382 = vector.broadcast %381 : vector<8x1xf32> to vector<8x16xf32>
    %383 = arith.subf %379, %382 : vector<8x16xf32>
    %384 = math.exp %383 : vector<8x16xf32>
    %cst_92 = arith.constant dense<0.000000e+00> : vector<8xf32>
    %385 = vector.multi_reduction <add>, %384, %cst_92 [1] : vector<8x16xf32> to vector<8xf32>
    %386 = vector.shape_cast %385 : vector<8xf32> to vector<8x1xf32>
    %387 = math.log %386 : vector<8x1xf32>
    %388 = arith.mulf %384, %383 : vector<8x16xf32>
    %cst_93 = arith.constant dense<0.000000e+00> : vector<8xf32>
    %389 = vector.multi_reduction <add>, %388, %cst_93 [1] : vector<8x16xf32> to vector<8xf32>
    %390 = vector.shape_cast %389 : vector<8xf32> to vector<8x1xf32>
    %391 = arith.divf %390, %386 : vector<8x1xf32>
    %392 = arith.subf %387, %391 : vector<8x1xf32>
    %cst_94 = arith.constant 0.000000e+00 : f32
    %393 = vector.broadcast %cst_94 : f32 to vector<8x1xf32>
    %394 = arith.subf %393, %387 : vector<8x1xf32>
    %395 = vector.broadcast %381 : vector<8x1xf32> to vector<8x16xf32>
    %396 = arith.cmpf oge, %379, %395 : vector<8x16xf32>
    %c16_i32_95 = arith.constant 16 : i32
    %397 = vector.broadcast %c16_i32_95 : i32 to vector<8x16xi32>
    %398 = arith.select %396, %18, %397 : vector<8x16xi1>, vector<8x16xi32>
    %cst_96 = arith.constant dense<2147483647> : vector<8xi32>
    %399 = vector.multi_reduction <minsi>, %398, %cst_96 [1] : vector<8x16xi32> to vector<8xi32>
    %400 = vector.shape_cast %399 : vector<8xi32> to vector<8x1xi32>
    %401 = vector.broadcast %400 : vector<8x1xi32> to vector<8x16xi32>
    %402 = arith.cmpi eq, %18, %401 : vector<8x16xi32>
    %403 = arith.extui %402 : vector<8x16xi1> to vector<8x16xi32>
    %404 = arith.sitofp %403 : vector<8x16xi32> to vector<8x16xf32>
    %405 = arith.mulf %394, %373 : vector<8x1xf32>
    %406 = arith.addf %350, %405 : vector<8x1xf32>
    %407 = arith.mulf %392, %373 : vector<8x1xf32>
    %408 = arith.addf %352, %407 : vector<8x1xf32>
    %409 = arith.addf %353, %373 : vector<8x1xf32>
    %cst_97 = arith.constant dense<0.000000e+00> : vector<8x64xf32>
    %410 = tpu.matmul %404, %7, %cst_97 {dimension_numbers = #tpu.dot_dimension_numbers<[1], [0], [0], [1], [0, 0, 1, 1], [], []>} : vector<8x16xf32>, vector<16x64xf32>, vector<8x64xf32> -> vector<8x64xf32>
    %411 = vector.extract_strided_slice %410 {offsets = [0, 32], sizes = [8, 32], strides = [1, 1]} : vector<8x64xf32> to vector<8x32xf32>
    %cst_98 = arith.constant dense<0.000000e+00> : vector<8x32xf32>
    %412 = tpu.matmul %360, %8, %cst_98 {dimension_numbers = #tpu.dot_dimension_numbers<[1], [0], [0], [1], [0, 0, 1, 1], [], []>} : vector<8x32xf32>, vector<32x32xf32>, vector<8x32xf32> -> vector<8x32xf32>
    %413 = arith.addf %411, %412 : vector<8x32xf32>
    %414 = arith.addf %413, %15 : vector<8x32xf32>
    %415 = math.tanh %414 : vector<8x32xf32>
    %cst_99 = arith.constant 5.000000e-01 : f32
    %416 = vector.broadcast %cst_99 : f32 to vector<8x1xf32>
    %417 = arith.cmpf ogt, %373, %416 : vector<8x1xf32>
    %c0_i32_100 = arith.constant 0 : i32
    %418 = vector.broadcast %c0_i32_100 : i32 to vector<8x1xi32>
    %419 = arith.cmpi eq, %400, %418 : vector<8x1xi32>
    %420 = arith.andi %417, %419 : vector<8x1xi1>
    %421 = vector.shape_cast %420 : vector<8x1xi1> to vector<8x1xi1>
    %422 = vector.broadcast %421 : vector<8x1xi1> to vector<8x32xi1>
    %423 = arith.select %422, %415, %368 : vector<8x32xi1>, vector<8x32xf32>
    %c0_i32_101 = arith.constant 0 : i32
    %424 = vector.broadcast %c0_i32_101 : i32 to vector<8x1xi32>
    %425 = arith.cmpi ne, %400, %424 : vector<8x1xi32>
    %426 = arith.extui %425 : vector<8x1xi1> to vector<8x1xi32>
    %427 = arith.sitofp %426 : vector<8x1xi32> to vector<8x1xf32>
    %428 = arith.mulf %373, %427 : vector<8x1xf32>
    %429 = arith.addf %409, %428 : vector<8x1xf32>
    %430 = vector.extract_strided_slice %7 {offsets = [0, 32], sizes = [1, 32], strides = [1, 1]} : vector<16x64xf32> to vector<1x32xf32>
    %431 = vector.shape_cast %430 : vector<1x32xf32> to vector<1x32xf32>
    %432 = vector.broadcast %431 : vector<1x32xf32> to vector<8x32xf32>
    %cst_102 = arith.constant dense<0.000000e+00> : vector<8x32xf32>
    %433 = tpu.matmul %415, %8, %cst_102 {dimension_numbers = #tpu.dot_dimension_numbers<[1], [0], [0], [1], [0, 0, 1, 1], [], []>} : vector<8x32xf32>, vector<32x32xf32>, vector<8x32xf32> -> vector<8x32xf32>
    %434 = arith.addf %432, %433 : vector<8x32xf32>
    %435 = arith.addf %434, %15 : vector<8x32xf32>
    %436 = math.tanh %435 : vector<8x32xf32>
    %cst_103 = arith.constant 5.000000e-01 : f32
    %437 = vector.broadcast %cst_103 : f32 to vector<8x1xf32>
    %438 = arith.cmpf ogt, %428, %437 : vector<8x1xf32>
    %439 = vector.shape_cast %438 : vector<8x1xi1> to vector<8x1xi1>
    %440 = vector.broadcast %439 : vector<8x1xi1> to vector<8x32xi1>
    %441 = arith.select %440, %436, %423 : vector<8x32xi1>, vector<8x32xf32>
    %cst_104 = arith.constant dense<0.000000e+00> : vector<8x4xf32>
    %442 = tpu.matmul %441, %10, %cst_104 {dimension_numbers = #tpu.dot_dimension_numbers<[1], [0], [0], [1], [0, 0, 1, 1], [], []>} : vector<8x32xf32>, vector<32x4xf32>, vector<8x4xf32> -> vector<8x4xf32>
    %443 = vector.broadcast %11 : vector<1x4xf32> to vector<8x4xf32>
    %444 = arith.addf %442, %443 : vector<8x4xf32>
    %445 = arith.subf %0, %444 : vector<8x4xf32>
    %446 = arith.mulf %445, %445 : vector<8x4xf32>
    %cst_105 = arith.constant dense<0.000000e+00> : vector<8xf32>
    %447 = vector.multi_reduction <add>, %446, %cst_105 [1] : vector<8x4xf32> to vector<8xf32>
    %448 = vector.shape_cast %447 : vector<8xf32> to vector<8x1xf32>
    %cst_106 = arith.constant 4.000000e+00 : f32
    %449 = vector.broadcast %cst_106 : f32 to vector<8x1xf32>
    %450 = arith.divf %448, %449 : vector<8x1xf32>
    %451 = arith.divf %408, %429 : vector<8x1xf32>
    %cst_107 = arith.constant dense<0.000000e+00> : vector<1xf32>
    %452 = vector.multi_reduction <add>, %451, %cst_107 [0] : vector<8x1xf32> to vector<1xf32>
    %453 = vector.shape_cast %452 : vector<1xf32> to vector<1x1xf32>
    %cst_108 = arith.constant 8.000000e+00 : f32
    %454 = vector.broadcast %cst_108 : f32 to vector<1x1xf32>
    %455 = arith.divf %453, %454 : vector<1x1xf32>
    %cst_109 = arith.constant 1.000000e-01 : f32
    %456 = vector.broadcast %cst_109 : f32 to vector<1x1xf32>
    %457 = arith.mulf %455, %456 : vector<1x1xf32>
    %cst_110 = arith.constant 0.00999999977 : f32
    %458 = vector.broadcast %cst_110 : f32 to vector<8x1xf32>
    %459 = arith.mulf %429, %458 : vector<8x1xf32>
    %cst_111 = arith.constant 0.000000e+00 : f32
    %460 = vector.broadcast %cst_111 : f32 to vector<8x1xf32>
    %461 = arith.subf %459, %460 : vector<8x1xf32>
    %462 = arith.mulf %461, %406 : vector<8x1xf32>
    %cst_112 = arith.constant dense<0.000000e+00> : vector<1xf32>
    %463 = vector.multi_reduction <add>, %462, %cst_112 [0] : vector<8x1xf32> to vector<1xf32>
    %464 = vector.shape_cast %463 : vector<1xf32> to vector<1x1xf32>
    %cst_113 = arith.constant 8.000000e+00 : f32
    %465 = vector.broadcast %cst_113 : f32 to vector<1x1xf32>
    %466 = arith.divf %464, %465 : vector<1x1xf32>
    %cst_114 = arith.constant 0.000000e+00 : f32
    %467 = vector.broadcast %cst_114 : f32 to vector<8x1xf32>
    %468 = arith.subf %450, %467 : vector<8x1xf32>
    %469 = arith.mulf %468, %406 : vector<8x1xf32>
    %cst_115 = arith.constant dense<0.000000e+00> : vector<1xf32>
    %470 = vector.multi_reduction <add>, %469, %cst_115 [0] : vector<8x1xf32> to vector<1xf32>
    %471 = vector.shape_cast %470 : vector<1xf32> to vector<1x1xf32>
    %cst_116 = arith.constant 8.000000e+00 : f32
    %472 = vector.broadcast %cst_116 : f32 to vector<1x1xf32>
    %473 = arith.divf %471, %472 : vector<1x1xf32>
    %cst_117 = arith.constant dense<0.000000e+00> : vector<1xf32>
    %474 = vector.multi_reduction <add>, %450, %cst_117 [0] : vector<8x1xf32> to vector<1xf32>
    %475 = vector.shape_cast %474 : vector<1xf32> to vector<1x1xf32>
    %cst_118 = arith.constant 8.000000e+00 : f32
    %476 = vector.broadcast %cst_118 : f32 to vector<1x1xf32>
    %477 = arith.divf %475, %476 : vector<1x1xf32>
    %478 = arith.addf %466, %473 : vector<1x1xf32>
    %479 = arith.subf %478, %457 : vector<1x1xf32>
    %480 = arith.addf %479, %477 : vector<1x1xf32>
    %cst_119 = arith.constant 0.000000e+00 : f32
    %481 = vector.broadcast %cst_119 : f32 to vector<8x1xf32>
    %482 = tpu.concatenate %51, %108, %165, %222, %279, %336, %392, %481 in 1 : vector<8x1xf32>, vector<8x1xf32>, vector<8x1xf32>, vector<8x1xf32>, vector<8x1xf32>, vector<8x1xf32>, vector<8x1xf32>, vector<8x1xf32> -> vector<8x8xf32>
    %483 = arith.sitofp %59 : vector<8x1xi32> to vector<8x1xf32>
    %484 = arith.sitofp %116 : vector<8x1xi32> to vector<8x1xf32>
    %485 = arith.sitofp %173 : vector<8x1xi32> to vector<8x1xf32>
    %486 = arith.sitofp %230 : vector<8x1xi32> to vector<8x1xf32>
    %487 = arith.sitofp %287 : vector<8x1xi32> to vector<8x1xf32>
    %488 = arith.sitofp %344 : vector<8x1xi32> to vector<8x1xf32>
    %489 = arith.sitofp %400 : vector<8x1xi32> to vector<8x1xf32>
    %490 = tpu.concatenate %483, %484, %485, %486, %487, %488, %489, %481 in 1 : vector<8x1xf32>, vector<8x1xf32>, vector<8x1xf32>, vector<8x1xf32>, vector<8x1xf32>, vector<8x1xf32>, vector<8x1xf32>, vector<8x1xf32> -> vector<8x8xf32>
    %491 = vector.shape_cast %480 : vector<1x1xf32> to vector<1x1xf32>
    %492 = vector.broadcast %491 : vector<1x1xf32> to vector<8x1xf32>
    %cst_120 = arith.constant 0.000000e+00 : f32
    %493 = vector.broadcast %cst_120 : f32 to vector<8x105xf32>
    %494 = tpu.concatenate %492, %450, %429, %444, %482, %490, %493 in 1 : vector<8x1xf32>, vector<8x1xf32>, vector<8x1xf32>, vector<8x4xf32>, vector<8x8xf32>, vector<8x8xf32>, vector<8x105xf32> -> vector<8x128xf32>
    %c0_121 = arith.constant 0 : index
    %c0_122 = arith.constant 0 : index
    %495 = vector.load %arg2[%c0_121, %c0_122] : memref<8x128xf32, #tpu.memory_space<vmem>>, vector<8x128xf32>
    tpu.vector_store %arg2[%c0_121, %c0_122], %494 {strides = array<i32>} : memref<8x128xf32, #tpu.memory_space<vmem>>, vector<8x128xf32>,
    return
  }
}

</mosaic_0001>

<bundles_post_ra>
// kernel: game_forward.1
= control target key start
LH: loop header
LB: loop body
LE: loop exit
PB: predicated region body
PF: predicated region fallthrough
CT: control target
= control target key end

     0   :  { %vm55_vm0 = vcmask 1043456   ;;  %vm51_vm1 = vcmask 31744   ;;  %v3105_v0 = vmov 0.0   ;;  %vm3106_vm2 = vmmov 0   ;;  %s3108_s23 = smov 112   ;;  %s3109_s14 = smov 32   ;;  %s3742_s1 = inlined_call_operand.vmem [shape: f32[168,64], index: 1, kind: input, shape index: {}]   ;;  %s3743_s0 = inlined_call_operand.vmem [shape: f32[8,4], index: 0, kind: input, shape index: {}]   ;;  %s3744_s2 = inlined_call_operand.vmem [shape: f32[8,128], index: 2, kind: output, shape index: {}]  }
   0x1   :  { %2656 = vmatprep.subr.mxu1 %v3105_v0  ;;  %v12_v1 = vld [vmem:[%s3742_s1] sm:$0xf]  ;;  %2658 = vmatprep.mubr.msk.f32.mxu1 %vm3106_vm2, %v3105_v0  ;;  %v17_v3 = vld [vmem:[%s3742_s1 + $0x28] sm:$0xff]  ;;  %v18_v4 = vld [vmem:[%s3742_s1 + $0x30] sm:$0xff]  ;;  %v3107_v5 = vmov 0.0|0.0   ;;  %vm129_vm3 = vcmask 261120   ;;  %v45_v27 = vlaneseq }
   0x2   :  { %v11_v2 = vld [vmem:[%s3743_s0] sm:$0xff]  ;;  %2657 = vmatpush3.msk.msra.mxu1 %vm55_vm0, %v12_v1  ;;  %2903 = vmatprep.subr.bf16.mxu0 %v3107_v5  ;;  %v3147_v6 = vpack.c.bf16 %v18_v4, %v17_v3  ;;  %v19_v7 = vld [vmem:[%s3742_s1 + $0x38] sm:$0xff]  ;;  %v2506_v10 = vld [vmem:[%s3742_s1 + $0x8] ss:$0 sm:$0xff]  ;;  %vm288_vm4 = vcmask 130048   ;;  %vm2451_vm10 = vcmask 7168  }
   0x3   :  { %2659 = vmatmul.mubr.msk.f32.vlgmr.msra.gmra.mrb[0].mxu1 %vm51_vm1, %v11_v2  ;;  %2897 = vmatprep.subr.bf16.mxu1 %v3107_v5  ;;  %v20_v8 = vld [vmem:[%s3742_s1 + $0x40] sm:$0xff]  ;;  %v2510_v16 = vld [vmem:[%s3742_s1 + $0x10] ss:$0 sm:$0xff]  ;;  %v3182_v17 = vld [vmem:[%s3742_s1 + $0x18] ss:$0 sm:$0xff]  ;;  %v3199_v28 = vand.u32 127, %v45_v27 }
   0x4   :  { %2669 = vmatprep.mubr.msk.f32.mxu1 %vm3106_vm2, %v3105_v0  ;;  %2680 = vmatprep.mubr.msk.f32.mxu0 %vm3106_vm2, %v3105_v0  ;;  %v3163_v9 = vpack.c.bf16 %v20_v8, %v19_v7  ;;  %v3191_v22 = vld [vmem:[%s3742_s1 + $0x20] ss:$0 sm:$0xff]  ;;  %v21_v38 = vld [vmem:[%s3742_s1 + $0x48] sm:$0xff]  ;;  %v22_v39 = vld [vmem:[%s3742_s1 + $0x50] sm:$0xff]  ;;  %s3110_s17 = smov 96   ;;  %vm2453_vm15 = vcmask 15360  }
   0x5   :  { %2899 = vmatpush3.bf16.msra.mxu1 %v3147_v6  ;;  %2905 = vmatpush3.bf16.msra.mxu0 %v3147_v6  ;;  %v3213_v40 = vpack.c.bf16 %v22_v39, %v21_v38  ;;  %v23_v62 = vld [vmem:[%s3742_s1 + $0x58] sm:$0xff]  ;;  %v24_v63 = vld [vmem:[%s3742_s1 + $0x60] sm:$0xff]  ;;  %v25_v1 = vld [vmem:[%s3742_s1 + $0x68] sm:$0xff]  ;;  %s3111_s4 = smov 3   ;;  %s3112_s5 = smov 15  }
   0x6   :  { %2900 = vmatprep.subr.bf16.mxu1 %v3107_v5  ;;  %2906 = vmatprep.subr.bf16.mxu0 %v3107_v5  ;;  %v3257_v2 = vpack.c.bf16 %v24_v63, %v23_v62  ;;  %v26_v3 = vld [vmem:[%s3742_s1 + $0x70] sm:$0xff]  ;;  %v2504_v39 = vld [vmem:[%s3742_s1 + $0x78] ss:$0 sm:$0xff] }
   0x7   :  { %v3263_v4 = vpack.c.bf16 %v26_v3, %v25_v1 }
   0x9   :  { %2902 = vmatpush3.bf16.msra.mxu1 %v3163_v9  ;;  %2908 = vmatpush3.bf16.msra.mxu0 %v3163_v9 }
   0xa   :  { %2909 = vmatprep.subr.bf16.mxu1 %v3107_v5  ;;  %2912 = vmatprep.subr.bf16.mxu0 %v3107_v5 }
  0xd6   :  { %v125_v11 = vpop.f32.mrb[0].mxu1 }
  0xd7   :  { %v126_v12 = vadd.f32 %v2506_v10, %v125_v11  ;;  %v2660_v13 = vpop.f32.mrb[1].mxu1 }
  0xd9   :  { %2670 = vmatmul.mubr.msk.f32.vlgmr.msra.gmra.mrb[2].mxu1 %vm129_vm3, %v126_v12 }
  0xda   :  { %2687 = vmatprep.mubr.msk.f32.mxu1 %vm3106_vm2, %v3105_v0  ;;  %2911 = vmatpush3.bf16.msra.mxu1 %v3213_v40 }
  0xdb   :  { %2918 = vmatprep.subr.bf16.mxu1 %v3107_v5 }
 0x1ac   :  { %v199_v14 = vpop.f32.mrb[2].mxu1 }
 0x1ad   :  { %208 = vrot.lane.b32.xlu0 %v199_v14, %s3108_s23  ;;  %v2671_v15 = vpop.f32.mrb[3].mxu1 }
 0x21f   :  { %v209_v18 = vpop.permute.xlu0 %208 }
 0x220   :  { %v211_v19 = vadd.f32 %v2510_v16, %v209_v18 }
 0x222   :  { %v212_v20 = vadd.f32 %v3182_v17, %v211_v19 }
 0x224   :  { %3029 = vtanh.f32 %v212_v20 }
 0x22e   :  { %v3030_v21 = vpop.eup %3029 }
 0x22f   :  { %2681 = vmatmul.mubr.msk.f32.vlgmr.msra.gmra.mrb[0].mxu0 %vm129_vm3, %v3030_v21 }
 0x230   :  { %2698 = vmatprep.mubr.msk.f32.mxu0 %vm3106_vm2, %v3105_v0  ;;  %2914 = vmatpush3.bf16.msra.mxu0 %v3257_v2 }
 0x231   :  { %2915 = vmatprep.subr.bf16.mxu0 %v3107_v5 }
 0x234   :  { %2917 = vmatpush3.bf16.msra.mxu0 %v3263_v4 }
 0x235   :  { %2924 = vmatprep.subr.bf16.mxu0 %v3107_v5 }
 0x237   :  { %2699 = vmatmul.mubr.f32.vlgmr.msra.gmra.mrb[2].mxu0 %v3105_v0 }
 0x238   :  { %2926 = vmatpush3.bf16.msra.mxu0 %v3213_v40  ;;  %2716 = vmatprep.mubr.msk.f32.mxu0 %vm3106_vm2, %v3105_v0 }
 0x239   :  { %2933 = vmatprep.subr.bf16.mxu0 %v3107_v5 }
 0x302   :  { %v283_v23 = vpop.f32.mrb[0].mxu0 }
 0x303   :  { %v3194_v24 = vadd.f32 %v3191_v22, %v283_v23  ;;  %v2682_v25 = vpop.f32.mrb[1].mxu0 }
 0x305   :  { %v289_v26 = vsel %vm288_vm4, %v3194_v24, -inf }
 0x306   :  { %290 = vmax.xlane.f32.xlu0 %v289_v26 }
 0x30a   :  { %v472_v12 = vpop.f32.mrb[2].mxu0 }
 0x30b   :  { %v2700_v13 = vpop.f32.mrb[3].mxu0 }
 0x393   :  { %v3201_v29 = vpop.xlane.xlu0 %290 }
 0x394   :  { %vm308_vm5 = vcmp.ge.f32.partialorder %v3194_v24, %v3201_v29 }
 0x395   :  { %v309_v30 = vsel %vm308_vm5, %v3199_v28, 16 }
 0x396   :  { %v310_v31 = vsel %vm288_vm4, %v309_v30, 2147483647 }
 0x397   :  { %v312_v32 = vshra.s32 %v310_v31, 16  ;;  %v311_v34 = vand.u32 65535, %v310_v31 }
 0x399   :  { %v314_v33 = vcvt.s32.f32 %v312_v32  ;;  %v313_v36 = vcvt.s32.f32 %v311_v34 }
 0x39b   :  { %315 = vmin.xlane.f32.xlu1 %v314_v33 }
 0x428   :  { %v316_v35 = vpop.xlane.xlu1 %315 }
 0x429   :  { %vm317_vm6 = vcmp.eq.f32.partialorder %v314_v33, %v316_v35  ;;  %v322_v41 = vcvt.f32.s32 %v316_v35 }
 0x42a   :  { %v318_v37 = vsel %vm317_vm6, %v313_v36, inf }
 0x42b   :  { %319 = vmin.xlane.f32.xlu1 %v318_v37  ;;  %v323_v43 = vshll.u32 %v322_v41, 16 }
 0x43c   :  { %497 = vrot.lane.b32.xlu1 %v283_v23, %s3108_s23 }
 0x4b8   :  { %v320_v42 = vpop.xlane.xlu1 %319 }
 0x4b9   :  { %v321_v44 = vcvt.f32.s32 %v320_v42 }
 0x4bb   :  { %v3218_v45 = vadd.s32 %v323_v43, %v321_v44 }
 0x4bc   :  { %v498_v47 = vpop.permute.xlu1 %497 }
 0x4bd   :  { %vm325_vm7 = vcmp.eq.s32.totalorder %v3199_v28, %v3218_v45  ;;  %v2464_v20 = vcvt.s32.f32 %v3218_v45  ;;  %vm488_vm13 = vcmp.eq.s32.totalorder %v3218_v45, 0 }
 0x4be   :  { %v2512_v46 = vsel %vm325_vm7, 1.0, %v3105_v0  ;;  %vm493_vm7 = vcmp.ne.s32.totalorder %v3218_v45, 0 }
 0x4bf   :  { %2688 = vmatmul.mubr.msk.f32.vlgmr.msra.gmra.mrb[4].mxu1 %vm288_vm4, %v2512_v46 }
 0x4c0   :  { %2920 = vmatpush3.bf16.msra.mxu1 %v3147_v6  ;;  %2709 = vmatprep.mubr.msk.f32.mxu1 %vm3106_vm2, %v3105_v0 }
 0x4c1   :  { %2921 = vmatprep.subr.bf16.mxu1 %v3107_v5 }
 0x4c4   :  { %2923 = vmatpush3.bf16.msra.mxu1 %v3163_v9 }
 0x4c5   :  { %2927 = vmatprep.subr.bf16.mxu1 %v3107_v5 }
 0x592   :  { %v3230_v48 = vpop.f32.mrb[4].mxu1 }
 0x593   :  { %v500_v49 = vadd.f32 %v498_v47, %v3230_v48  ;;  %v2689_v50 = vpop.f32.mrb[5].mxu1 }
 0x595   :  { %v501_v51 = vadd.f32 %v3182_v17, %v500_v49 }
 0x597   :  { %3031 = vtanh.f32 %v501_v51 }
 0x5a1   :  { %v3032_v52 = vpop.eup %3031 }
 0x5a2   :  { %2710 = vmatmul.mubr.msk.f32.vlgmr.msra.gmra.mrb[6].mxu1 %vm129_vm3, %v3032_v52 }
 0x5a3   :  { %2727 = vmatprep.mubr.msk.f32.mxu1 %vm3106_vm2, %v3105_v0  ;;  %2929 = vmatpush3.bf16.msra.mxu1 %v3257_v2 }
 0x5a4   :  { %2930 = vmatprep.subr.bf16.mxu1 %v3107_v5 }
 0x5a7   :  { %2932 = vmatpush3.bf16.msra.mxu1 %v3263_v4 }
 0x5a8   :  { %2939 = vmatprep.subr.bf16.mxu1 %v3107_v5 }
 0x675   :  { %v572_v53 = vpop.f32.mrb[6].mxu1 }
 0x676   :  { %v3238_v54 = vadd.f32 %v3191_v22, %v572_v53  ;;  %v2711_v55 = vpop.f32.mrb[7].mxu1 }
 0x678   :  { %v577_v56 = vsel %vm288_vm4, %v3238_v54, -inf }
 0x679   :  { %578 = vmax.xlane.f32.xlu1 %v577_v56 }
 0x706   :  { %v3242_v57 = vpop.xlane.xlu1 %578 }
 0x707   :  { %vm596_vm8 = vcmp.ge.f32.partialorder %v3238_v54, %v3242_v57 }
 0x708   :  { %v597_v58 = vsel %vm596_vm8, %v3199_v28, 16 }
 0x709   :  { %v598_v59 = vsel %vm288_vm4, %v597_v58, 2147483647 }
 0x70a   :  { %v600_v60 = vshra.s32 %v598_v59, 16  ;;  %v599_v7 = vand.u32 65535, %v598_v59 }
 0x70c   :  { %v602_v61 = vcvt.s32.f32 %v600_v60  ;;  %v601_v10 = vcvt.s32.f32 %v599_v7 }
 0x70e   :  { %603 = vmin.xlane.f32.xlu0 %v602_v61 }
 0x79b   :  { %v604_v8 = vpop.xlane.xlu0 %603 }
 0x79c   :  { %vm605_vm9 = vcmp.eq.f32.partialorder %v602_v61, %v604_v8  ;;  %v610_v14 = vcvt.f32.s32 %v604_v8 }
 0x79d   :  { %v606_v11 = vsel %vm605_vm9, %v601_v10, inf }
 0x79e   :  { %607 = vmin.xlane.f32.xlu0 %v606_v11  ;;  %v611_v16 = vshll.u32 %v610_v14, 16 }
 0x7b4   :  { %787 = vrot.lane.b32.xlu0 %v572_v53, %s3108_s23 }
 0x82b   :  { %v608_v15 = vpop.xlane.xlu0 %607 }
 0x82c   :  { %v609_v18 = vcvt.f32.s32 %v608_v15 }
 0x82e   :  { %v3278_v19 = vadd.s32 %v611_v16, %v609_v18 }
 0x82f   :  { %v788_v26 = vpop.permute.xlu0 %787 }
 0x830   :  { %v2465_v21 = vcvt.s32.f32 %v3278_v19  ;;  %vm613_vm11 = vcmp.eq.s32.totalorder %v3199_v28, %v3278_v19  ;;  %vm777_vm8 = vcmp.eq.s32.totalorder %v3278_v19, 0 }
 0x831   :  { %v2516_v23 = vsel %vm613_vm11, 1.0, %v3105_v0 }
 0x832   :  { %2717 = vmatmul.mubr.msk.f32.vlgmr.msra.gmra.mrb[4].mxu0 %vm288_vm4, %v2516_v23  ;;  %v3287_v25 = vsel %vm2451_vm10, %v2464_v20, %v2465_v21 }
 0x833   :  { %2935 = vmatpush3.bf16.msra.mxu0 %v3147_v6  ;;  %2738 = vmatprep.mubr.msk.f32.mxu0 %vm3106_vm2, %v3105_v0 }
 0x834   :  { %2936 = vmatprep.subr.bf16.mxu0 %v3107_v5 }
 0x837   :  { %2938 = vmatpush3.bf16.msra.mxu0 %v3163_v9 }
 0x838   :  { %2942 = vmatprep.subr.bf16.mxu0 %v3107_v5 }
 0x905   :  { %v3295_v30 = vpop.f32.mrb[4].mxu0 }
 0x906   :  { %v790_v31 = vadd.f32 %v788_v26, %v3295_v30  ;;  %v2718_v32 = vpop.f32.mrb[5].mxu0 }
 0x908   :  { %v791_v33 = vadd.f32 %v3182_v17, %v790_v31 }
 0x90a   :  { %3033 = vtanh.f32 %v791_v33 }
 0x914   :  { %v3034_v34 = vpop.eup %3033 }
 0x915   :  { %2739 = vmatmul.mubr.msk.f32.vlgmr.msra.gmra.mrb[6].mxu0 %vm129_vm3, %v3034_v34 }
 0x916   :  { %2944 = vmatpush3.bf16.msra.mxu0 %v3257_v2  ;;  %2756 = vmatprep.mubr.msk.f32.mxu0 %vm3106_vm2, %v3105_v0 }
 0x917   :  { %2945 = vmatprep.subr.bf16.mxu0 %v3107_v5 }
 0x91a   :  { %2947 = vmatpush3.bf16.msra.mxu0 %v3263_v4 }
 0x91b   :  { %2954 = vmatprep.subr.bf16.mxu0 %v3107_v5 }
 0x9e8   :  { %v862_v35 = vpop.f32.mrb[6].mxu0 }
 0x9e9   :  { %v3307_v36 = vadd.f32 %v3191_v22, %v862_v35  ;;  %v2740_v37 = vpop.f32.mrb[7].mxu0 }
 0x9eb   :  { %v867_v38 = vsel %vm288_vm4, %v3307_v36, -inf }
 0x9ec   :  { %868 = vmax.xlane.f32.xlu1 %v867_v38 }
 0x9fd   :  { %477 = vrot.lane.b32.xlu1 %v472_v12, %s3109_s14 }
 0xa01   :  { %482 = vrot.lane.b32.xlu1 %v2504_v39, %s3109_s14 }
 0xa79   :  { %v3316_v41 = vpop.xlane.xlu1 %868 }
 0xa7a   :  { %vm886_vm12 = vcmp.ge.f32.partialorder %v3307_v36, %v3316_v41 }
 0xa7b   :  { %v887_v42 = vsel %vm886_vm12, %v3199_v28, 16  ;;  %vm2455_vm12 = vcmask 23552  }
 0xa7c   :  { %v888_v43 = vsel %vm288_vm4, %v887_v42, 2147483647 }
 0xa7d   :  { %v478_v44 = vpop.permute.xlu1 %477  ;;  %v890_v46 = vshra.s32 %v888_v43, 16  ;;  %v889_v55 = vand.u32 65535, %v888_v43 }
 0xa7e   :  { %v480_v49 = vadd.f32 %v478_v44, %v3230_v48 }
 0xa7f   :  { %v892_v47 = vcvt.s32.f32 %v890_v46  ;;  %v891_v58 = vcvt.s32.f32 %v889_v55 }
 0xa81   :  { %893 = vmin.xlane.f32.xlu0 %v892_v47  ;;  %v3323_v50 = vpop.permute.xlu1 %482 }
 0xa82   :  { %v485_v51 = vadd.f32 %v3323_v50, %v480_v49 }
 0xa84   :  { %3035 = vtanh.f32 %v485_v51 }
 0xa8e   :  { %v3036_v52 = vpop.eup %3035 }
 0xa8f   :  { %v3327_v53 = vsel %vm488_vm13, %v3036_v52, 0.0 }
 0xa97   :  { %695 = vrot.lane.b32.xlu0 %v3036_v52, %s3110_s17  ;;  %v3378_v52 = vsel %vm493_vm7, 1.0, %v3105_v0 }
 0xa98   :  { %vm776_vm9 = vcmp.gt.f32.partialorder %v3378_v52, 0.5 }
 0xa99   :  { %vm3384_vm11 = vmand %vm776_vm9, %vm777_vm8 }
 0xa9b   :  { %1077 = vrot.lane.b32.xlu0 %v862_v35, %s3108_s23 }
 0xb0e   :  { %v894_v56 = vpop.xlane.xlu0 %893 }
 0xb0f   :  { %vm895_vm14 = vcmp.eq.f32.partialorder %v892_v47, %v894_v56  ;;  %v900_v60 = vcvt.f32.s32 %v894_v56 }
 0xb10   :  { %v896_v48 = vsel %vm895_vm14, %v891_v58, inf }
 0xb11   :  { %897 = vmin.xlane.f32.xlu1 %v896_v48  ;;  %v901_v62 = vshll.u32 %v900_v60, 16 }
 0xb12   :  { %v696_v59 = vpop.permute.xlu0 %695 }
 0xb13   :  { %2728 = vmatmul.mubr.msk.f32.vlgmr.msra.gmra.mrb[8].mxu1 %vm129_vm3, %v696_v59 }
 0xb14   :  { %2941 = vmatpush3.bf16.msra.mxu1 %v3213_v40  ;;  %2745 = vmatprep.mubr.msk.f32.mxu1 %vm3106_vm2, %v3105_v0 }
 0xb15   :  { %2948 = vmatprep.subr.bf16.mxu1 %v3107_v5 }
 0xb16   :  { %v1078_v12 = vpop.permute.xlu0 %1077 }
 0xb9e   :  { %v898_v61 = vpop.xlane.xlu1 %897 }
 0xb9f   :  { %v899_v63 = vcvt.f32.s32 %v898_v61 }
 0xba1   :  { %v3336_v1 = vadd.s32 %v901_v62, %v899_v63 }
 0xba3   :  { %v2466_v3 = vcvt.s32.f32 %v3336_v1  ;;  %vm903_vm0 = vcmp.eq.s32.totalorder %v3199_v28, %v3336_v1 }
 0xba4   :  { %v2521_v7 = vsel %vm903_vm0, 1.0, %v3105_v0 }
 0xba5   :  { %2746 = vmatmul.mubr.msk.f32.vlgmr.msra.gmra.mrb[10].mxu1 %vm288_vm4, %v2521_v7  ;;  %v3345_v8 = vsel %vm2453_vm15, %v3287_v25, %v2466_v3 }
 0xba6   :  { %2950 = vmatpush3.bf16.msra.mxu1 %v3147_v6  ;;  %2767 = vmatprep.mubr.msk.f32.mxu1 %vm3106_vm2, %v3105_v0 }
 0xba7   :  { %2951 = vmatprep.subr.bf16.mxu1 %v3107_v5 }
 0xbaa   :  { %2953 = vmatpush3.bf16.msra.mxu1 %v3163_v9 }
 0xbab   :  { %2957 = vmatprep.subr.bf16.mxu1 %v3107_v5 }
 0xbe6   :  { %v765_v10 = vpop.f32.mrb[8].mxu1 }
 0xbe7   :  { %v2729_v11 = vpop.f32.mrb[9].mxu1 }
 0xc78   :  { %v3353_v13 = vpop.f32.mrb[10].mxu1 }
 0xc79   :  { %v1080_v14 = vadd.f32 %v1078_v12, %v3353_v13  ;;  %v2747_v15 = vpop.f32.mrb[11].mxu1 }
 0xc7b   :  { %v1081_v16 = vadd.f32 %v3182_v17, %v1080_v14 }
 0xc7d   :  { %3037 = vtanh.f32 %v1081_v16 }
 0xc87   :  { %v3038_v18 = vpop.eup %3037 }
 0xc88   :  { %2768 = vmatmul.mubr.msk.f32.vlgmr.msra.gmra.mrb[12].mxu1 %vm129_vm3, %v3038_v18 }
 0xc89   :  { %2959 = vmatpush3.bf16.msra.mxu1 %v3257_v2  ;;  %2785 = vmatprep.mubr.msk.f32.mxu1 %vm3106_vm2, %v3105_v0 }
 0xc8a   :  { %2960 = vmatprep.subr.bf16.mxu1 %v3107_v5 }
 0xc8d   :  { %2962 = vmatpush3.bf16.msra.mxu1 %v3263_v4 }
 0xc8e   :  { %2969 = vmatprep.subr.bf16.mxu1 %v3107_v5 }
 0xd5b   :  { %v1152_v20 = vpop.f32.mrb[12].mxu1 }
 0xd5c   :  { %v1156_v21 = vadd.f32 %v3191_v22, %v1152_v20  ;;  %v2769_v23 = vpop.f32.mrb[13].mxu1 }
 0xd5e   :  { %v1157_v25 = vsel %vm288_vm4, %v1156_v21, -inf }
 0xd5f   :  { %1158 = vmax.xlane.f32.xlu0 %v1157_v25 }
 0xdec   :  { %v1159_v26 = vpop.xlane.xlu0 %1158 }
 0xded   :  { %v1160_v31 = vsub.f32 %v1156_v21, %v1159_v26  ;;  %vm1176_vm5 = vcmp.ge.f32.partialorder %v1156_v21, %v1159_v26 }
 0xdee   :  { %v1177_v32 = vsel %vm1176_vm5, %v3199_v28, 16  ;;  %vm782_vm5 = vcmp.ne.s32.totalorder %v3278_v19, 0 }
 0xdef   :  { %v1161_v33 = vmul.f32 1.442695, %v1160_v31  ;;  %v1178_v34 = vsel %vm288_vm4, %v1177_v32, 2147483647 }
 0xdf0   :  { %v1180_v35 = vshra.s32 %v1178_v34, 16  ;;  %v1179_v42 = vand.u32 65535, %v1178_v34 }
 0xdf1   :  { %3039 = vpow2.f32 %v1161_v33 }
 0xdf2   :  { %v1182_v37 = vcvt.s32.f32 %v1180_v35  ;;  %v1181_v44 = vcvt.s32.f32 %v1179_v42 }
 0xdf4   :  { %1183 = vmin.xlane.f32.xlu1 %v1182_v37 }
 0xdfb   :  { %v3368_v38 = vpop.eup %3039 }
 0xdfc   :  { %v3371_v39 = vmul.f32 %v3368_v38, %v1160_v31 }
 0xe05   :  { %770 = vrot.lane.b32.xlu1 %v765_v10, %s3109_s14 }
 0xe81   :  { %v1184_v43 = vpop.xlane.xlu1 %1183 }
 0xe82   :  { %vm1185_vm6 = vcmp.eq.f32.partialorder %v1182_v37, %v1184_v43  ;;  %v1190_v58 = vcvt.f32.s32 %v1184_v43 }
 0xe83   :  { %v1186_v46 = vsel %vm1185_vm6, %v1181_v44, inf  ;;  %vm1067_vm6 = vcmp.eq.s32.totalorder %v3336_v1, 0 }
 0xe84   :  { %1187 = vmin.xlane.f32.xlu1 %v1186_v46  ;;  %v1191_v59 = vshll.u32 %v1190_v58, 16 }
 0xe85   :  { %v771_v47 = vpop.permute.xlu1 %770 }
 0xe86   :  { %v773_v49 = vadd.f32 %v771_v47, %v3295_v30  ;;  %v2519_v47 = vsel %vm782_vm5, 1.0, %v3105_v0 }
 0xe88   :  { %v774_v51 = vadd.f32 %v773_v49, %v3323_v50  ;;  %v3445_v49 = vmul.f32 %v2519_v47, %v3378_v52 }
 0xe8a   :  { %3041 = vtanh.f32 %v774_v51  ;;  %vm1066_vm7 = vcmp.gt.f32.partialorder %v3445_v49, 0.5 }
 0xe8b   :  { %vm1068_vm8 = vmand %vm1066_vm7, %vm1067_vm6  ;;  %vm2458_vm7 = vcmask 39936  }
 0xe94   :  { %v3382_v55 = vpop.eup %3041 }
 0xe95   :  { %985 = vrot.lane.b32.xlu0 %v3382_v55, %s3110_s17  ;;  %v781_v45 = vsel %vm3384_vm11, %v3382_v55, %v3327_v53  ;;  %vm1072_vm11 = vcmp.ne.s32.totalorder %v3336_v1, 0 }
 0xe99   :  { %1367 = vrot.lane.b32.xlu0 %v1152_v20, %s3108_s23 }
 0xf07   :  { %v986_v30 = vpop.permute.xlu0 %985 }
 0xf08   :  { %2757 = vmatmul.mubr.msk.f32.vlgmr.msra.gmra.mrb[8].mxu0 %vm129_vm3, %v986_v30 }
 0xf09   :  { %2956 = vmatpush3.bf16.msra.mxu0 %v3213_v40  ;;  %2774 = vmatprep.mubr.msk.f32.mxu0 %vm3106_vm2, %v3105_v0 }
 0xf0a   :  { %2963 = vmatprep.subr.bf16.mxu0 %v3107_v5 }
 0xf0b   :  { %v1368_v11 = vpop.permute.xlu0 %1367 }
 0xf11   :  { %v1188_v48 = vpop.xlane.xlu1 %1187 }
 0xf12   :  { %v1189_v60 = vcvt.f32.s32 %v1188_v48 }
 0xf14   :  { %v3400_v61 = vadd.s32 %v1191_v59, %v1189_v60 }
 0xf16   :  { %v2467_v62 = vcvt.s32.f32 %v3400_v61  ;;  %vm1193_vm13 = vcmp.eq.s32.totalorder %v3199_v28, %v3400_v61 }
 0xf17   :  { %v2526_v63 = vsel %vm1193_vm13, 1.0, %v3105_v0  ;;  %vm1357_vm13 = vcmp.eq.s32.totalorder %v3400_v61, 0 }
 0xf18   :  { %2775 = vmatmul.mubr.msk.f32.vlgmr.msra.gmra.mrb[10].mxu0 %vm288_vm4, %v2526_v63  ;;  %v3409_v3 = vsel %vm2455_vm12, %v3345_v8, %v2467_v62 }
 0xf19   :  { %2965 = vmatpush3.bf16.msra.mxu0 %v3147_v6  ;;  %2796 = vmatprep.mubr.msk.f32.mxu0 %vm3106_vm2, %v3105_v0 }
 0xf1a   :  { %2966 = vmatprep.subr.bf16.mxu0 %v3107_v5 }
 0xf1d   :  { %2968 = vmatpush3.bf16.msra.mxu0 %v3163_v9 }
 0xf1e   :  { %2972 = vmatprep.subr.bf16.mxu0 %v3107_v5 }
 0xfdb   :  { %v1055_v7 = vpop.f32.mrb[8].mxu0 }
 0xfdc   :  { %v2758_v10 = vpop.f32.mrb[9].mxu0 }
 0xfeb   :  { %v3417_v12 = vpop.f32.mrb[10].mxu0 }
 0xfec   :  { %v1370_v14 = vadd.f32 %v1368_v11, %v3417_v12  ;;  %v2776_v8 = vpop.f32.mrb[11].mxu0 }
 0xfee   :  { %v1371_v15 = vadd.f32 %v3182_v17, %v1370_v14 }
 0xff0   :  { %3043 = vtanh.f32 %v1371_v15 }
 0xffa   :  { %v3044_v16 = vpop.eup %3043 }
 0xffb   :  { %2797 = vmatmul.mubr.msk.f32.vlgmr.msra.gmra.mrb[12].mxu0 %vm129_vm3, %v3044_v16 }
 0xffc   :  { %2974 = vmatpush3.bf16.msra.mxu0 %v3257_v2  ;;  %2814 = vmatprep.mubr.msk.f32.mxu0 %vm3106_vm2, %v3105_v0 }
 0xffd   :  { %2975 = vmatprep.subr.bf16.mxu0 %v3107_v5 }
0x1000   :  { %2977 = vmatpush3.bf16.msra.mxu0 %v3263_v4 }
0x1001   :  { %2984 = vmatprep.subr.bf16.mxu0 %v3107_v5 }
0x10ce   :  { %v1442_v18 = vpop.f32.mrb[12].mxu0 }
0x10cf   :  { %v3429_v20 = vadd.f32 %v3191_v22, %v1442_v18  ;;  %v2798_v21 = vpop.f32.mrb[13].mxu0 }
0x10d1   :  { %v1447_v23 = vsel %vm288_vm4, %v3429_v20, -inf }
0x10d2   :  { %1448 = vmax.xlane.f32.xlu0 %v1447_v23 }
0x115f   :  { %v3433_v25 = vpop.xlane.xlu0 %1448 }
0x1160   :  { %vm1466_vm14 = vcmp.ge.f32.partialorder %v3429_v20, %v3433_v25 }
0x1161   :  { %v1467_v26 = vsel %vm1466_vm14, %v3199_v28, 16 }
0x1162   :  { %v1468_v31 = vsel %vm288_vm4, %v1467_v26, 2147483647 }
0x1163   :  { %v1470_v32 = vshra.s32 %v1468_v31, 16  ;;  %v1469_v34 = vand.u32 65535, %v1468_v31 }
0x1165   :  { %v1472_v33 = vcvt.s32.f32 %v1470_v32  ;;  %v1471_v37 = vcvt.s32.f32 %v1469_v34 }
0x1167   :  { %1473 = vmin.xlane.f32.xlu1 %v1472_v33 }
0x1178   :  { %1060 = vrot.lane.b32.xlu1 %v1055_v7, %s3109_s14 }
0x11f4   :  { %v1474_v35 = vpop.xlane.xlu1 %1473 }
0x11f5   :  { %vm1475_vm0 = vcmp.eq.f32.partialorder %v1472_v33, %v1474_v35  ;;  %v1480_v30 = vcvt.f32.s32 %v1474_v35 }
0x11f6   :  { %v1476_v42 = vsel %vm1475_vm0, %v1471_v37, inf }
0x11f7   :  { %1477 = vmin.xlane.f32.xlu1 %v1476_v42  ;;  %v1481_v56 = vshll.u32 %v1480_v30, 16 }
0x11f8   :  { %v1061_v43 = vpop.permute.xlu1 %1060 }
0x11f9   :  { %v1063_v44 = vadd.f32 %v1061_v43, %v3353_v13 }
0x11fb   :  { %v1064_v46 = vadd.f32 %v1063_v44, %v3323_v50 }
0x11fd   :  { %3045 = vtanh.f32 %v1064_v46 }
0x1207   :  { %v3046_v51 = vpop.eup %3045 }
0x1208   :  { %1275 = vrot.lane.b32.xlu0 %v3046_v51, %s3110_s17  ;;  %v3455_v19 = vsel %vm1068_vm8, %v3046_v51, %v781_v45 }
0x120c   :  { %1657 = vrot.lane.b32.xlu0 %v1442_v18, %s3108_s23  ;;  %v2524_v18 = vsel %vm1072_vm11, 1.0, %v3105_v0 }
0x120d   :  { %v3497_v21 = vmul.f32 %v2524_v18, %v3445_v49 }
0x120f   :  { %vm1356_vm14 = vcmp.gt.f32.partialorder %v3497_v21, 0.5 }
0x1210   :  { %vm3503_vm0 = vmand %vm1356_vm14, %vm1357_vm13 }
0x127a   :  { %v1276_v13 = vpop.permute.xlu0 %1275 }
0x127b   :  { %2786 = vmatmul.mubr.msk.f32.vlgmr.msra.gmra.mrb[14].mxu1 %vm129_vm3, %v1276_v13 }
0x127c   :  { %2971 = vmatpush3.bf16.msra.mxu1 %v3213_v40  ;;  %2803 = vmatprep.mubr.msk.f32.mxu1 %vm3106_vm2, %v3105_v0 }
0x127d   :  { %2978 = vmatprep.subr.bf16.mxu1 %v3107_v5 }
0x127e   :  { %v1658_v63 = vpop.permute.xlu0 %1657 }
0x1284   :  { %v1478_v58 = vpop.xlane.xlu1 %1477 }
0x1285   :  { %v1479_v48 = vcvt.f32.s32 %v1478_v58 }
0x1287   :  { %v3463_v59 = vadd.s32 %v1481_v56, %v1479_v48 }
0x1289   :  { %v2468_v53 = vcvt.s32.f32 %v3463_v59  ;;  %vm1483_vm9 = vcmp.eq.s32.totalorder %v3199_v28, %v3463_v59  ;;  %vm1647_vm11 = vcmp.eq.s32.totalorder %v3463_v59, 0 }
0x128a   :  { %v2531_v55 = vsel %vm1483_vm9, 1.0, %v3105_v0  ;;  %vm1362_vm9 = vcmp.ne.s32.totalorder %v3400_v61, 0 }
0x128b   :  { %2804 = vmatmul.mubr.msk.f32.vlgmr.msra.gmra.mrb[16].mxu1 %vm288_vm4, %v2531_v55  ;;  %v3472_v45 = vsel %vm51_vm1, %v3409_v3, %v2468_v53 }
0x128c   :  { %2980 = vmatpush3.bf16.msra.mxu1 %v3147_v6  ;;  %2825 = vmatprep.mubr.msk.f32.mxu1 %vm3106_vm2, %v3105_v0 }
0x128d   :  { %2981 = vmatprep.subr.bf16.mxu1 %v3107_v5 }
0x1290   :  { %2983 = vmatpush3.bf16.msra.mxu1 %v3163_v9 }
0x1291   :  { %2987 = vmatprep.subr.bf16.mxu1 %v3107_v5 }
0x134e   :  { %v1345_v60 = vpop.f32.mrb[14].mxu1 }
0x134f   :  { %1350 = vrot.lane.b32.xlu1 %v1345_v60, %s3109_s14  ;;  %v2787_v62 = vpop.f32.mrb[15].mxu1 }
0x135e   :  { %v3481_v7 = vpop.f32.mrb[16].mxu1 }
0x135f   :  { %v1660_v3 = vadd.f32 %v1658_v63, %v3481_v7  ;;  %v2805_v10 = vpop.f32.mrb[17].mxu1 }
0x1361   :  { %v1661_v11 = vadd.f32 %v3182_v17, %v1660_v3 }
0x1363   :  { %3047 = vtanh.f32 %v1661_v11 }
0x136d   :  { %v3048_v14 = vpop.eup %3047 }
0x136e   :  { %2826 = vmatmul.mubr.msk.f32.vlgmr.msra.gmra.mrb[18].mxu1 %vm129_vm3, %v3048_v14 }
0x136f   :  { %2989 = vmatpush3.bf16.msra.mxu1 %v3257_v2  ;;  %2843 = vmatprep.mubr.msk.f32.mxu1 %vm3106_vm2, %v3105_v0 }
0x1370   :  { %2990 = vmatprep.subr.bf16.mxu1 %v3107_v5 }
0x1373   :  { %2992 = vmatpush3.bf16.msra.mxu1 %v3263_v4 }
0x1374   :  { %2999 = vmatprep.subr.bf16.mxu1 %v3107_v5 }
0x13c1   :  { %v1351_v8 = vpop.permute.xlu1 %1350 }
0x13c2   :  { %v1353_v15 = vadd.f32 %v1351_v8, %v3417_v12 }
0x13c4   :  { %v1354_v16 = vadd.f32 %v1353_v15, %v3323_v50 }
0x13c6   :  { %3049 = vtanh.f32 %v1354_v16 }
0x13d0   :  { %v3501_v23 = vpop.eup %3049 }
0x13d1   :  { %v1361_v1 = vsel %vm3503_vm0, %v3501_v23, %v3455_v19  ;;  %vm1652_vm0 = vcmp.ne.s32.totalorder %v3463_v59, 0 }
0x1441   :  { %v1732_v12 = vpop.f32.mrb[18].mxu1 }
0x1442   :  { %v1736_v31 = vadd.f32 %v3191_v22, %v1732_v12  ;;  %v2827_v32 = vpop.f32.mrb[19].mxu1 }
0x1444   :  { %v1737_v33 = vsel %vm288_vm4, %v1736_v31, -inf }
0x1445   :  { %1738 = vmax.xlane.f32.xlu0 %v1737_v33 }
0x145b   :  { %1565 = vrot.lane.b32.xlu0 %v3501_v23, %s3110_s17 }
0x14d2   :  { %v1739_v34 = vpop.xlane.xlu0 %1738 }
0x14d3   :  { %v1740_v35 = vsub.f32 %v1736_v31, %v1739_v34  ;;  %vm1756_vm5 = vcmp.ge.f32.partialorder %v1736_v31, %v1739_v34 }
0x14d4   :  { %v1757_v37 = vsel %vm1756_vm5, %v3199_v28, 16 }
0x14d5   :  { %v1741_v42 = vmul.f32 1.442695, %v1740_v35  ;;  %v1758_v43 = vsel %vm288_vm4, %v1757_v37, 2147483647 }
0x14d6   :  { %v1566_v44 = vpop.permute.xlu0 %1565  ;;  %v1760_v46 = vshra.s32 %v1758_v43, 16  ;;  %v1759_v30 = vand.u32 65535, %v1758_v43 }
0x14d7   :  { %3051 = vpow2.f32 %v1741_v42  ;;  %2815 = vmatmul.mubr.msk.f32.vlgmr.msra.gmra.mrb[14].mxu0 %vm129_vm3, %v1566_v44  ;;  %v2534_v44 = vsel %vm1652_vm0, 1.0, %v3105_v0 }
0x14d8   :  { %v1762_v47 = vcvt.s32.f32 %v1760_v46  ;;  %2986 = vmatpush3.bf16.msra.mxu0 %v3213_v40  ;;  %2832 = vmatprep.mubr.msk.f32.mxu0 %vm3106_vm2, %v3105_v0  ;;  %v1761_v56 = vcvt.s32.f32 %v1759_v30 }
0x14d9   :  { %2993 = vmatprep.subr.bf16.mxu0 %v3107_v5 }
0x14da   :  { %1763 = vmin.xlane.f32.xlu1 %v1762_v47 }
0x14e1   :  { %v3522_v51 = vpop.eup %3051 }
0x14e2   :  { %v3525_v13 = vmul.f32 %v3522_v51, %v1740_v35 }
0x1567   :  { %v1764_v58 = vpop.xlane.xlu1 %1763 }
0x1568   :  { %vm1765_vm6 = vcmp.eq.f32.partialorder %v1762_v47, %v1764_v58  ;;  %v1770_v60 = vcvt.f32.s32 %v1764_v58  ;;  %v31_v47 = vld [vmem:[%s3742_s1 + $0x98] sm:$0xff] }
0x1569   :  { %v1766_v48 = vsel %vm1765_vm6, %v1761_v56, inf }
0x156a   :  { %1767 = vmin.xlane.f32.xlu0 %v1766_v48  ;;  %v1771_v63 = vshll.u32 %v1770_v60, 16  ;;  %v292_v60 = vsub.f32 %v3194_v24, %v3201_v29 }
0x15aa   :  { %v1635_v53 = vpop.f32.mrb[14].mxu0 }
0x15ab   :  { %1640 = vrot.lane.b32.xlu1 %v1635_v53, %s3109_s14  ;;  %v2816_v55 = vpop.f32.mrb[15].mxu0 }
0x15af   :  { %1947 = vrot.lane.b32.xlu1 %v1732_v12, %s3108_s23 }
0x15f7   :  { %v1768_v62 = vpop.xlane.xlu0 %1767 }
0x15f8   :  { %v1769_v3 = vcvt.f32.s32 %v1768_v62  ;;  %v293_v62 = vmul.f32 1.442695, %v292_v60 }
0x15fa   :  { %v3529_v10 = vadd.s32 %v1771_v63, %v1769_v3  ;;  %v870_v63 = vsub.f32 %v3307_v36, %v3316_v41  ;;  %v580_v36 = vsub.f32 %v3238_v54, %v3242_v57 }
0x15fc   :  { %vm1773_vm8 = vcmp.eq.s32.totalorder %v3199_v28, %v3529_v10  ;;  %v2469_v11 = vcvt.s32.f32 %v3529_v10  ;;  %vm1937_vm5 = vcmp.eq.s32.totalorder %v3529_v10, 0  ;;  %v871_v3 = vmul.f32 1.442695, %v870_v63 }
0x15fd   :  { %v2536_v14 = vsel %vm1773_vm8, 1.0, %v3105_v0  ;;  %vm1942_vm0 = vcmp.ne.s32.totalorder %v3529_v10, 0 }
0x15fe   :  { %2833 = vmatmul.mubr.msk.f32.vlgmr.msra.gmra.mrb[16].mxu0 %vm288_vm4, %v2536_v14  ;;  %v3538_v8 = vsel %vm2458_vm7, %v3472_v45, %v2469_v11  ;;  %v2529_v45 = vsel %vm1362_vm9, 1.0, %v3105_v0  ;;  %v1450_v14 = vsub.f32 %v3429_v20, %v3433_v25  ;;  %v581_v20 = vmul.f32 1.442695, %v580_v36 }
0x15ff   :  { %2995 = vmatpush3.bf16.msra.mxu0 %v3147_v6  ;;  %2854 = vmatprep.mubr.msk.f32.mxu0 %vm3106_vm2, %v3105_v0  ;;  %v3551_v6 = vmul.f32 %v2529_v45, %v3497_v21  ;;  %v1163_v25 = vsel %vm288_vm4, %v3368_v38, 0.0 }
0x1600   :  { %2996 = vmatprep.subr.bf16.mxu0 %v3107_v5 }
0x1601   :  { %vm1646_vm13 = vcmp.gt.f32.partialorder %v3551_v6, 0.5  ;;  %v3583_v46 = vmul.f32 %v2534_v44, %v3551_v6 }
0x1602   :  { %vm1648_vm14 = vmand %vm1646_vm13, %vm1647_vm11 }
0x1603   :  { %2998 = vmatpush3.bf16.msra.mxu0 %v3163_v9  ;;  %vm1936_vm6 = vcmp.gt.f32.partialorder %v3583_v46, 0.5 }
0x1604   :  { %3002 = vmatprep.subr.bf16.mxu0 %v3107_v5  ;;  %vm3589_vm8 = vmand %vm1936_vm6, %vm1937_vm5 }
0x161d   :  { %v1641_v15 = vpop.permute.xlu1 %1640 }
0x161e   :  { %v1643_v16 = vadd.f32 %v1641_v15, %v3481_v7 }
0x1620   :  { %v1644_v18 = vadd.f32 %v1643_v16, %v3323_v50 }
0x1621   :  { %v1948_v7 = vpop.permute.xlu1 %1947 }
0x1622   :  { %3053 = vtanh.f32 %v1644_v18  ;;  %v1451_v18 = vmul.f32 1.442695, %v1450_v14 }
0x162c   :  { %v3054_v9 = vpop.eup %3053 }
0x162d   :  { %1855 = vrot.lane.b32.xlu1 %v3054_v9, %s3110_s17  ;;  %v3561_v61 = vsel %vm1648_vm14, %v3054_v9, %v1361_v1  ;;  %vm2460_vm14 = vcmask 48128  }
0x169f   :  { %v1856_v12 = vpop.permute.xlu1 %1855 }
0x16a0   :  { %2844 = vmatmul.mubr.msk.f32.vlgmr.msra.gmra.mrb[20].mxu1 %vm129_vm3, %v1856_v12 }
0x16a1   :  { %3001 = vmatpush3.bf16.msra.mxu1 %v3213_v40  ;;  %2861 = vmatprep.mubr.msk.f32.mxu1 %vm3106_vm2, %v3105_v0 }
0x16a2   :  { %3008 = vmatprep.subr.bf16.mxu1 %v3107_v5 }
0x16d1   :  { %v1850_v31 = vpop.f32.mrb[16].mxu0 }
0x16d2   :  { %v1950_v32 = vadd.f32 %v1948_v7, %v1850_v31  ;;  %v2834_v33 = vpop.f32.mrb[17].mxu0 }
0x16d3   :  { %v1743_v33 = vsel %vm288_vm4, %v3522_v51, 0.0 }
0x16d4   :  { %v1951_v26 = vadd.f32 %v3182_v17, %v1950_v32 }
0x16d6   :  { %3055 = vtanh.f32 %v1951_v26 }
0x16e0   :  { %v3056_v19 = vpop.eup %3055 }
0x16e1   :  { %2855 = vmatmul.mubr.msk.f32.vlgmr.msra.gmra.mrb[18].mxu0 %vm129_vm3, %v3056_v19 }
0x16e2   :  { %3004 = vmatpush3.bf16.msra.mxu0 %v3257_v2  ;;  %2872 = vmatprep.mubr.msk.f32.mxu0 %vm3106_vm2, %v3105_v0 }
0x16e3   :  { %3005 = vmatprep.subr.bf16.mxu0 %v3107_v5 }
0x16e6   :  { %3007 = vmatpush3.bf16.msra.mxu0 %v3263_v4 }
0x16e7   :  { %3014 = vmatprep.subr.bf16.mxu0 %v3107_v5 }
0x1773   :  { %v1925_v40 = vpop.f32.mrb[20].mxu1 }
0x1774   :  { %1930 = vrot.lane.b32.xlu0 %v1925_v40, %s3109_s14  ;;  %v2845_v23 = vpop.f32.mrb[21].mxu1 }
0x17b4   :  { %v2022_v17 = vpop.f32.mrb[18].mxu0 }
0x17b5   :  { %v2026_v1 = vadd.f32 %v3191_v22, %v2022_v17  ;;  %v2856_v34 = vpop.f32.mrb[19].mxu0 }
0x17b7   :  { %v2027_v35 = vsel %vm288_vm4, %v2026_v1, -inf }
0x17b8   :  { %2028 = vmax.xlane.f32.xlu1 %v2027_v35 }
0x17e6   :  { %v1931_v37 = vpop.permute.xlu0 %1930 }
0x17e7   :  { %v1933_v42 = vadd.f32 %v1931_v37, %v1850_v31 }
0x17e9   :  { %v1934_v43 = vadd.f32 %v1933_v42, %v3323_v50 }
0x17eb   :  { %3057 = vtanh.f32 %v1934_v43 }
0x17ec   :  { %3059 = vpow2.f32 %v293_v62 }
0x17ed   :  { %3061 = vpow2.f32 %v871_v3 }
0x17ee   :  { %3063 = vpow2.f32 %v1451_v18  ;;  %v28_v18 = vld [vmem:[%s3742_s1 + $0x80] sm:$0xff] }
0x17f5   :  { %v3587_v22 = vpop.eup %3057 }
0x17f6   :  { %2145 = vrot.lane.b32.xlu1 %v3587_v22, %s3110_s17  ;;  %v1941_v59 = vsel %vm3589_vm8, %v3587_v22, %v3561_v61  ;;  %v3060_v9 = vpop.eup %3059  ;;  %v30_v61 = vld [vmem:[%s3742_s1 + $0x90] sm:$0xff] }
0x17f7   :  { %v295_v29 = vsel %vm288_vm4, %v3060_v9, 0.0  ;;  %v3062_v7 = vpop.eup %3061  ;;  %v300_v57 = vmul.f32 %v3060_v9, %v292_v60  ;;  %v2238_v9 = vshrl.u32 %v45_v27, 7 }
0x17f8   :  { %v873_v12 = vsel %vm288_vm4, %v3062_v7, 0.0  ;;  %v3064_v31 = vpop.eup %3063  ;;  %v878_v17 = vmul.f32 %v3062_v7, %v870_v63 }
0x17f9   :  { %v1453_v32 = vsel %vm288_vm4, %v3064_v31, 0.0  ;;  %v301_v40 = vsel %vm288_vm4, %v300_v57, 0.0  ;;  %v1458_v51 = vmul.f32 %v3064_v31, %v1450_v14 }
0x17fb   :  { %v1459_v34 = vsel %vm288_vm4, %v1458_v51, 0.0 }
0x1845   :  { %v2029_v30 = vpop.xlane.xlu1 %2028 }
0x1846   :  { %vm2046_vm9 = vcmp.ge.f32.partialorder %v2026_v1, %v2029_v30  ;;  %v2030_v24 = vsub.f32 %v2026_v1, %v2029_v30  ;;  %v879_v1 = vsel %vm288_vm4, %v878_v17, 0.0 }
0x1847   :  { %v2047_v58 = vsel %vm2046_vm9, %v3199_v28, 16 }
0x1848   :  { %v2048_v56 = vsel %vm288_vm4, %v2047_v58, 2147483647  ;;  %v2031_v41 = vmul.f32 1.442695, %v2030_v24 }
0x1849   :  { %v2050_v48 = vshra.s32 %v2048_v56, 16  ;;  %v2049_v11 = vand.u32 65535, %v2048_v56 }
0x184a   :  { %3065 = vpow2.f32 %v2031_v41 }
0x184b   :  { %v2052_v53 = vcvt.s32.f32 %v2050_v48  ;;  %v2051_v16 = vcvt.s32.f32 %v2049_v11  ;;  %3067 = vpow2.f32 %v581_v20 }
0x184d   :  { %2053 = vmin.xlane.f32.xlu0 %v2052_v53 }
0x1854   :  { %v3066_v26 = vpop.eup %3065 }
0x1855   :  { %v2033_v54 = vsel %vm288_vm4, %v3066_v26, 0.0  ;;  %v3620_v19 = vpop.eup %3067  ;;  %v2038_v35 = vmul.f32 %v3066_v26, %v2030_v24  ;;  %v2239_v24 = vsub.s32 0, %v2238_v9 }
0x1856   :  { %v588_v38 = vmul.f32 %v3620_v19, %v580_v36  ;;  %v583_v31 = vsel %vm288_vm4, %v3620_v19, 0.0  ;;  %v620_v19 = vadd.f32 1.0, %v3378_v52 }
0x1857   :  { %v2039_v37 = vsel %vm288_vm4, %v2038_v35, 0.0 }
0x1858   :  { %v589_v23 = vsel %vm288_vm4, %v588_v38, 0.0 }
0x1868   :  { %v2146_v55 = vpop.permute.xlu1 %2145 }
0x1869   :  { %2873 = vmatmul.mubr.msk.f32.vlgmr.msra.gmra.mrb[20].mxu0 %vm129_vm3, %v2146_v55 }
0x186a   :  { %2894 = vmatprep.mubr.msk.f32.mxu0 %vm3106_vm2, %v3105_v0 }
0x18da   :  { %v2054_v15 = vpop.xlane.xlu0 %2053 }
0x18db   :  { %vm2055_vm11 = vcmp.eq.f32.partialorder %v2052_v53, %v2054_v15  ;;  %v2060_v44 = vcvt.f32.s32 %v2054_v15 }
0x18dc   :  { %v2056_v45 = vsel %vm2055_vm11, %v2051_v16, inf }
0x18dd   :  { %2057 = vmin.xlane.f32.xlu1 %v2056_v45  ;;  %v2061_v58 = vshll.u32 %v2060_v44, 16  ;;  %v29_v45 = vld [vmem:[%s3742_s1 + $0x88] sm:$0xff] }
0x18de   :  { %v3015_v22 = vpack.c.bf16 %v29_v45, %v28_v18 }
0x18e0   :  { %3016 = vmatpush3.bf16.msra.mxu0 %v3015_v22 }
0x18e1   :  { %296 = vadd.xlane.f32.xlu1 %v295_v29  ;;  %3017 = vmatprep.subr.bf16.mxu0 %v3107_v5  ;;  %v3103_v29 = vld [vmem:[%s3742_s1 + $0x48] sm:$0xff] }
0x18e2   :  { %v2240_v7 = vrot.slane %v3103_v29, %v2239_v24 }
0x18e5   :  { %874 = vadd.xlane.f32.xlu1 %v873_v12 }
0x18e9   :  { %1164 = vadd.xlane.f32.xlu1 %v1163_v25 }
0x18ed   :  { %1454 = vadd.xlane.f32.xlu1 %v1453_v32 }
0x18f1   :  { %1744 = vadd.xlane.f32.xlu1 %v1743_v33 }
0x18f5   :  { %2034 = vadd.xlane.f32.xlu1 %v2033_v54 }
0x18f9   :  { %302 = vadd.xlane.f32.xlu1 %v301_v40 }
0x18fd   :  { %590 = vadd.xlane.f32.xlu1 %v589_v23 }
0x1901   :  { %880 = vadd.xlane.f32.xlu1 %v879_v1 }
0x1905   :  { %1460 = vadd.xlane.f32.xlu1 %v1459_v34  ;;  %v910_v34 = vadd.f32 %v3445_v49, %v620_v19 }
0x1909   :  { %2040 = vadd.xlane.f32.xlu1 %v2039_v37 }
0x193c   :  { %v2215_v42 = vpop.f32.mrb[20].mxu0 }
0x193d   :  { %2220 = vrot.lane.b32.xlu0 %v2215_v42, %s3109_s14  ;;  %v2874_v43 = vpop.f32.mrb[21].mxu0  ;;  %v1200_v42 = vadd.f32 %v3497_v21, %v910_v34 }
0x196a   :  { %v2058_v30 = vpop.xlane.xlu1 %2057 }
0x196b   :  { %v2059_v56 = vcvt.f32.s32 %v2058_v30 }
0x196d   :  { %v2062_v48 = vadd.s32 %v2061_v58, %v2059_v56  ;;  %v1490_v58 = vadd.f32 %v3551_v6, %v1200_v42 }
0x196e   :  { %v297_v33 = vpop.xlane.xlu1 %296 }
0x196f   :  { %vm2063_vm13 = vcmp.eq.s32.totalorder %v3199_v28, %v2062_v48  ;;  %v2470_v55 = vcvt.s32.f32 %v2062_v48  ;;  %vm2232_vm8 = vcmp.ne.s32.totalorder %v2062_v48, 0 }
0x1970   :  { %v2541_v53 = vsel %vm2063_vm13, 1.0, %v3105_v0  ;;  %v2544_v20 = vsel %vm2232_vm8, 1.0, %v3105_v0 }
0x1971   :  { %2862 = vmatmul.mubr.msk.f32.vlgmr.msra.gmra.mrb[22].mxu1 %vm288_vm4, %v2541_v53  ;;  %v3637_v60 = vsel %vm2460_vm14, %v3538_v8, %v2470_v55 }
0x1972   :  { %3010 = vmatpush3.bf16.msra.mxu1 %v3257_v2  ;;  %2883 = vmatprep.mubr.msk.f32.mxu1 %vm3106_vm2, %v3105_v0  ;;  %v2539_v2 = vsel %vm1942_vm0, 1.0, %v3105_v0  ;;  %vm2227_vm2 = vcmp.eq.s32.totalorder %v2062_v48, 0  ;;  %v1749_v0 = vsel %vm288_vm4, %v3525_v13, 0.0  ;;  %v875_v26 = vpop.xlane.xlu1 %874 }
0x1973   :  { %3011 = vmatprep.subr.bf16.mxu1 %v3107_v5  ;;  %v3645_v14 = vmul.f32 %v2539_v2, %v3583_v46 }
0x1975   :  { %vm2226_vm5 = vcmp.gt.f32.partialorder %v3645_v14, 0.5  ;;  %v3676_v25 = vmul.f32 %v2544_v20, %v3645_v14 }
0x1976   :  { %3013 = vmatpush3.bf16.msra.mxu1 %v3263_v4  ;;  %vm2228_vm6 = vmand %vm2226_vm5, %vm2227_vm2  ;;  %v1165_v54 = vpop.xlane.xlu1 %1164 }
0x1977   :  { %vm2323_vm9 = vcmp.gt.f32.partialorder %v3676_v25, 0.5 }
0x197a   :  { %v1455_v57 = vpop.xlane.xlu1 %1454 }
0x197e   :  { %v1745_v40 = vpop.xlane.xlu1 %1744 }
0x1982   :  { %v2035_v38 = vpop.xlane.xlu1 %2034 }
0x1986   :  { %v303_v23 = vpop.xlane.xlu1 %302 }
0x19af   :  { %v2221_v28 = vpop.permute.xlu0 %2220 }
0x1a44   :  { %v2140_v62 = vpop.f32.mrb[22].mxu1 }
0x1a45   :  { %v2223_v63 = vadd.f32 %v2221_v28, %v2140_v62  ;;  %v2863_v3 = vpop.f32.mrb[23].mxu1  ;;  %v1780_v62 = vadd.f32 %v3583_v46, %v1490_v58 }
0x1a47   :  { %v2224_v11 = vadd.f32 %v2223_v63, %v3323_v50 }
0x1a49   :  { %3069 = vtanh.f32 %v2224_v11 }
0x1a53   :  { %v3070_v8 = vpop.eup %3069 }
0x1a54   :  { %2242 = vrot.lane.b32.xlu0 %v3070_v8, %s3110_s17  ;;  %v2231_v4 = vsel %vm2228_vm6, %v3070_v8, %v1941_v59  ;;  %v3018_v59 = vpack.c.bf16 %v31_v47, %v30_v61 }
0x1a56   :  { %3019 = vmatpush3.bf16.msra.mxu0 %v3018_v59 }
0x1ac6   :  { %v2243_v10 = vpop.permute.xlu0 %2242 }
0x1ac7   :  { %2884 = vmatmul.mubr.msk.f32.vlgmr.msra.gmra.mrb[24].mxu1 %vm129_vm3, %v2243_v10  ;;  %v2070_v10 = vadd.f32 %v3645_v14, %v1780_v62 }
0x1ac9   :  { %v3696_v29 = vadd.f32 %v3676_v25, %v2070_v10  ;;  %v3104_v10 = vld [vmem:[%s3743_s0] sm:$0xff]  ;;  %s3113_s0 = smov 7  }
0x1b9a   :  { %v2312_v15 = vpop.f32.mrb[24].mxu1 }
0x1b9b   :  { %2317 = vrot.lane.b32.xlu0 %v2312_v15, %s3109_s14  ;;  %v2885_v16 = vpop.f32.mrb[25].mxu1 }
0x1c0d   :  { %v2318_v36 = vpop.permute.xlu0 %2317 }
0x1c0e   :  { %v2320_v41 = vadd.f32 %v2318_v36, %v2240_v7 }
0x1c10   :  { %v2321_v12 = vadd.f32 %v2320_v41, %v3323_v50  ;;  %v1169_v50 = vsel %vm288_vm4, %v3371_v39, 0.0  ;;  %v591_v39 = vpop.xlane.xlu1 %590  ;;  %vm2496_vm4 = vcmask 187392  }
0x1c12   :  { %3071 = vtanh.f32 %v2321_v12 }
0x1c13   :  { %3073 = vlog2.f32 %v297_v33 }
0x1c14   :  { %3075 = vrcp.f32 %v297_v33  ;;  %v881_v1 = vpop.xlane.xlu1 %880 }
0x1c15   :  { %3077 = vlog2.f32 %v875_v26 }
0x1c16   :  { %3079 = vrcp.f32 %v875_v26 }
0x1c17   :  { %3081 = vlog2.f32 %v1165_v54 }
0x1c18   :  { %3083 = vrcp.f32 %v1165_v54  ;;  %v1461_v53 = vpop.xlane.xlu1 %1460 }
0x1c19   :  { %3085 = vlog2.f32 %v1455_v57 }
0x1c1c   :  { %v3072_v5 = vpop.eup %3071  ;;  %v2041_v12 = vpop.xlane.xlu1 %2040 }
0x1c1d   :  { %v2326_v27 = vsel %vm2323_vm9, %v3072_v5, %v2231_v4  ;;  %v3074_v17 = vpop.eup %3073 }
0x1c1e   :  { %2332 = vrot.lane.b32.xlu0 %v2326_v27, %s3110_s17  ;;  %v3076_v51 = vpop.eup %3075  ;;  %v299_v3 = vmul.f32 0.6931472, %v3074_v17 }
0x1c1f   :  { %v3078_v35 = vpop.eup %3077  ;;  %v305_v4 = vmul.f32 %v3076_v51, %v303_v23 }
0x1c20   :  { %v3080_v37 = vpop.eup %3079  ;;  %v877_v48 = vmul.f32 0.6931472, %v3078_v35  ;;  %v307_v41 = vsub.f32 0.0, %v299_v3 }
0x1c21   :  { %v3082_v43 = vpop.eup %3081  ;;  %v883_v28 = vmul.f32 %v3080_v37, %v881_v1 }
0x1c22   :  { %v3084_v30 = vpop.eup %3083  ;;  %v1167_v2 = vmul.f32 0.6931472, %v3082_v43  ;;  %v885_v45 = vsub.f32 0.0, %v877_v48 }
0x1c23   :  { %v3086_v56 = vpop.eup %3085  ;;  %v3693_v9 = vsub.f32 %v877_v48, %v883_v28  ;;  %v2424_v28 = vmul.f32 0.01, %v3696_v29 }
0x1c24   :  { %v1457_v61 = vmul.f32 0.6931472, %v3086_v56  ;;  %v1175_v5 = vsub.f32 0.0, %v1167_v2  ;;  %v906_v26 = vmul.f32 %v885_v45, %v3445_v49 }
0x1c26   :  { %v1465_v25 = vsub.f32 0.0, %v1457_v61  ;;  %v1196_v19 = vmul.f32 %v1175_v5, %v3497_v21 }
0x1c28   :  { %v1486_v34 = vmul.f32 %v1465_v25, %v3551_v6 }
0x1c3d   :  { %584 = vadd.xlane.f32.xlu0 %v583_v31  ;;  %v306_v31 = vsub.f32 %v299_v3, %v305_v4 }
0x1c41   :  { %1170 = vadd.xlane.f32.xlu0 %v1169_v50 }
0x1c45   :  { %1750 = vadd.xlane.f32.xlu0 %v1749_v0 }
0x1c90   :  { %v2333_v32 = vpop.permute.xlu0 %2332 }
0x1c91   :  { %2895 = vmatmul.mubr.msk.f32.vlgmr.msra.gmra.mrb[22].mxu0 %vm129_vm3, %v2333_v32  ;;  %vm2462_vm3 = vcmask 56320  }
0x1cca   :  { %v585_v13 = vpop.xlane.xlu0 %584 }
0x1ccb   :  { %3087 = vlog2.f32 %v585_v13 }
0x1ccc   :  { %3089 = vrcp.f32 %v585_v13 }
0x1ccd   :  { %3091 = vlog2.f32 %v1745_v40 }
0x1cce   :  { %3093 = vrcp.f32 %v1455_v57  ;;  %v1171_v44 = vpop.xlane.xlu0 %1170 }
0x1ccf   :  { %3095 = vlog2.f32 %v2035_v38  ;;  %v1173_v16 = vmul.f32 %v3084_v30, %v1171_v44 }
0x1cd0   :  { %3097 = vrcp.f32 %v1745_v40  ;;  %v908_v40 = vmul.f32 %v3693_v9, %v3445_v49 }
0x1cd1   :  { %3099 = vrcp.f32 %v2035_v38  ;;  %v1174_v0 = vsub.f32 %v1167_v2, %v1173_v16  ;;  %v2546_v2 = vld [vmem:[%s3742_s1 + $0xa0] ss:$0 sm:$0xff]  ;;  %v2477_v16 = vsel %vm2462_vm3, %v3637_v60, 0.0 }
0x1cd2   :  { %v1751_v47 = vpop.xlane.xlu0 %1750  ;;  %3101 = vrcp.f32 %v3696_v29 }
0x1cd3   :  { %v1198_v1 = vmul.f32 %v1174_v0, %v3497_v21 }
0x1cd5   :  { %v3088_v55 = vpop.eup %3087 }
0x1cd6   :  { %v3090_v63 = vpop.eup %3089  ;;  %v587_v11 = vmul.f32 0.6931472, %v3088_v55 }
0x1cd7   :  { %v3092_v8 = vpop.eup %3091  ;;  %v593_v15 = vmul.f32 %v3090_v63, %v591_v39 }
0x1cd8   :  { %v3094_v18 = vpop.eup %3093  ;;  %v595_v22 = vsub.f32 0.0, %v587_v11  ;;  %v1747_v27 = vmul.f32 0.6931472, %v3092_v8 }
0x1cd9   :  { %v3096_v59 = vpop.eup %3095  ;;  %v1463_v24 = vmul.f32 %v3094_v18, %v1461_v53  ;;  %v3698_v7 = vsub.f32 %v587_v11, %v593_v15 }
0x1cda   :  { %v3098_v36 = vpop.eup %3097  ;;  %v616_v20 = vmul.f32 %v3378_v52, %v595_v22  ;;  %v2037_v54 = vmul.f32 0.6931472, %v3096_v59 }
0x1cdb   :  { %v618_v50 = vmul.f32 %v3378_v52, %v3698_v7  ;;  %v1753_v32 = vmul.f32 %v3098_v36, %v1751_v47  ;;  %v3100_v33 = vpop.eup %3099  ;;  %v1464_v38 = vsub.f32 %v1457_v61, %v1463_v24  ;;  %v1755_v52 = vsub.f32 0.0, %v1747_v27 }
0x1cdc   :  { %v617_v57 = vadd.f32 %v616_v20, %v307_v41  ;;  %v2043_v23 = vmul.f32 %v3100_v33, %v2041_v12  ;;  %v2045_v35 = vsub.f32 0.0, %v2037_v54  ;;  %v3102_v3 = vpop.eup %3101  ;;  %v2452_v45 = vsel %vm2451_vm10, %v306_v31, %v3698_v7 }
0x1cdd   :  { %v619_v39 = vadd.f32 %v618_v50, %v306_v31  ;;  %v1754_v51 = vsub.f32 %v1747_v27, %v1753_v32  ;;  %v1488_v42 = vmul.f32 %v1464_v38, %v3551_v6  ;;  %v1776_v30 = vmul.f32 %v1755_v52, %v3583_v46 }
0x1cde   :  { %v907_v13 = vadd.f32 %v906_v26, %v617_v57  ;;  %v2044_v49 = vsub.f32 %v2037_v54, %v2043_v23  ;;  %v2066_v48 = vmul.f32 %v2045_v35, %v3645_v14  ;;  %v2454_v61 = vsel %vm2453_vm15, %v2452_v45, %v3693_v9 }
0x1cdf   :  { %v909_v17 = vadd.f32 %v908_v40, %v619_v39  ;;  %v1778_v56 = vmul.f32 %v1754_v51, %v3583_v46  ;;  %v2456_v22 = vsel %vm2455_vm12, %v2454_v61, %v1174_v0 }
0x1ce0   :  { %v1197_v37 = vadd.f32 %v1196_v19, %v907_v13  ;;  %v2068_v21 = vmul.f32 %v2044_v49, %v3645_v14  ;;  %v2457_v47 = vsel %vm51_vm1, %v2456_v22, %v1464_v38 }
0x1ce1   :  { %v1199_v43 = vadd.f32 %v1198_v1, %v909_v17  ;;  %v2459_v59 = vsel %vm2458_vm7, %v2457_v47, %v1754_v51 }
0x1ce2   :  { %v1487_v44 = vadd.f32 %v1486_v34, %v1197_v37  ;;  %v2461_v24 = vsel %vm2460_vm14, %v2459_v59, %v2044_v49 }
0x1ce3   :  { %v1489_v58 = vadd.f32 %v1488_v42, %v1199_v43  ;;  %v2463_v60 = vsel %vm2462_vm3, %v2461_v24, 0.0 }
0x1ce4   :  { %v1777_v53 = vadd.f32 %v1776_v30, %v1487_v44 }
0x1ce5   :  { %v1779_v55 = vadd.f32 %v1778_v56, %v1489_v58 }
0x1ce6   :  { %v2067_v62 = vadd.f32 %v2066_v48, %v1777_v53 }
0x1ce7   :  { %v2069_v63 = vadd.f32 %v2068_v21, %v1779_v55 }
0x1ce8   :  { %v2425_v6 = vmul.f32 %v2424_v28, %v2067_v62 }
0x1ce9   :  { %v2414_v11 = vmul.f32 %v3102_v3, %v2069_v63 }
0x1cea   :  { %v2426_v41 = vrot.slane %v2425_v6, 4 }
0x1ceb   :  { %v2415_v36 = vrot.slane %v2414_v11, 4 }
0x1cec   :  { %v2427_v20 = vadd.f32 %v2426_v41, %v2425_v6 }
0x1ced   :  { %v2416_v12 = vadd.f32 %v2415_v36, %v2414_v11 }
0x1cee   :  { %v2428_v27 = vrot.slane %v2427_v20, 2 }
0x1cef   :  { %v2417_v7 = vrot.slane %v2416_v12, 2 }
0x1cf0   :  { %v2429_v32 = vadd.f32 %v2428_v27, %v2427_v20 }
0x1cf1   :  { %v2418_v31 = vadd.f32 %v2417_v7, %v2416_v12 }
0x1cf2   :  { %v2430_v40 = vrot.slane %v2429_v32, 1 }
0x1cf3   :  { %v2419_v25 = vrot.slane %v2418_v31, 1 }
0x1cf4   :  { %v2431_v19 = vadd.f32 %v2430_v40, %v2429_v32 }
0x1cf5   :  { %v2420_v39 = vadd.f32 %v2419_v25, %v2418_v31 }
0x1cf6   :  { %v2432_v37 = vmul.f32 0.125, %v2431_v19 }
0x1cf7   :  { %v2422_v1 = vmul.f32 0.125, %v2420_v39 }
0x1cf9   :  { %v2423_v42 = vmul.f32 0.1, %v2422_v1 }
0x1d64   :  { %v2402_v8 = vpop.f32.mrb[22].mxu0 }
0x1d65   :  { %v2403_v4 = vadd.f32 %v2546_v2, %v2402_v8  ;;  %v2896_v46 = vpop.f32.mrb[23].mxu0 }
0x1d67   :  { %v2406_v14 = vsub.f32 %v3104_v10, %v2403_v4  ;;  %2479 = vrot.lane.b32.xlu1 %v2403_v4, %s3111_s4 }
0x1d69   :  { %v2407_v15 = vmul.f32 %v2406_v14, %v2406_v14 }
0x1d6b   :  { %2487 = vrot.lane.b32.xlu1 %v2477_v16, %s3112_s5  ;;  %v2408_v18 = vsel %vm51_vm1, %v2407_v15, 0.0  ;;  %vm2494_vm1 = vcmask 121856  }
0x1d6c   :  { %2409 = vadd.xlane.f32.xlu0 %v2408_v18 }
0x1d82   :  { %2483 = vrot.lane.b32.xlu0 %v2463_v60, %s3113_s0 }
0x1dd9   :  { %v2480_v30 = vpop.permute.xlu1 %2479 }
0x1ddd   :  { %v2488_v55 = vpop.permute.xlu1 %2487 }
0x1df9   :  { %v2410_v5 = vpop.xlane.xlu0 %2409 }
0x1dfa   :  { %v2412_v9 = vmul.f32 0.25, %v2410_v5 }
0x1dfc   :  { %v2433_v50 = vmul.f32 %v2412_v9, %v2067_v62  ;;  %v2441_v0 = vrot.slane %v2412_v9, 4 }
0x1dfd   :  { %v2484_v21 = vpop.permute.xlu0 %2483 }
0x1dfe   :  { %v2434_v33 = vrot.slane %v2433_v50, 4  ;;  %v2442_v26 = vadd.f32 %v2441_v0, %v2412_v9 }
0x1e00   :  { %v2435_v54 = vadd.f32 %v2434_v33, %v2433_v50  ;;  %v2443_v57 = vrot.slane %v2442_v26, 2 }
0x1e02   :  { %v2436_v38 = vrot.slane %v2435_v54, 2  ;;  %v2444_v23 = vadd.f32 %v2443_v57, %v2442_v26 }
0x1e04   :  { %v2437_v13 = vadd.f32 %v2436_v38, %v2435_v54  ;;  %v2445_v17 = vrot.slane %v2444_v23, 1 }
0x1e06   :  { %v2438_v52 = vrot.slane %v2437_v13, 1  ;;  %v2446_v35 = vadd.f32 %v2445_v17, %v2444_v23 }
0x1e08   :  { %v2439_v51 = vadd.f32 %v2438_v52, %v2437_v13  ;;  %v2447_v43 = vmul.f32 0.125, %v2446_v35 }
0x1e0a   :  { %v2440_v34 = vmul.f32 0.125, %v2439_v51 }
0x1e0c   :  { %v2448_v49 = vadd.f32 %v2440_v34, %v2432_v37 }
0x1e0e   :  { %v2449_v44 = vsub.f32 %v2448_v49, %v2423_v42 }
0x1e10   :  { %v2450_v58 = vadd.f32 %v2449_v44, %v2447_v43 }
0x1e12   :  { %v2490_v56 = vsel %vm2451_vm10, %v2450_v58, %v2412_v9 }
0x1e13   :  { %v2491_v48 = vsel %vm2453_vm15, %v2490_v56, %v3696_v29 }
0x1e14   :  { %v2492_v53 = vsel %vm2455_vm12, %v2491_v48, %v2480_v30 }
0x1e15   :  { %v2493_v28 = vsel %vm2462_vm3, %v2492_v53, %v2484_v21 }
0x1e16   :  { %v2495_v62 = vsel %vm2494_vm1, %v2493_v28, %v2488_v55 }
0x1e17   :  { %v2497_v63 = vsel %vm2496_vm4, %v2495_v62, 0.0 }
0x1e18   :  { %2498 = vst [vmem:[%s3744_s2] sm:$0xff] %v2497_v63 }

</bundles_post_ra>
